<compile_context>
chip_gen: v7x
topology: tpu7x:2x2x1
jax: 0.10.0
libtpu: 0.0.40
codegen_flags: <defaults>
</compile_context>

<pallas_src>
import functools

import jax
import jax.numpy as jnp
from jax.experimental import pallas as pl
from jax.experimental.pallas import tpu as pltpu

EMBED_DIM = 512          # CLIP image / text feature dim
FUSION_DIM = 1024        # 512 + 512
HIDDEN_DIM = 512
LANE = 128               # TPU lane width (output padding granularity)
BATCH_ALIGN = 16         # sublane alignment that is safe for bf16 blocks
BATCH_TILE = 512         # large-batch tile (amortizes per-grid-step overhead)
MIN_SPLIT_B = 128        # below this, weight DMA dominates -> keep one block
NORM_EPS = 1e-12         # torch.nn.functional.normalize-style clamp


def _round_up(x, m):
    return -(-x // m) * m


def _head_kernel(img_ref, txt_ref, w1a_ref, w1b_ref, b1_ref, w2_ref, b2_ref,
                 out_ref):
    """Fused L2-normalize + (split-W1) 2-layer MLP head for one batch tile."""
    img = img_ref[...].astype(jnp.float32)               # (tb, 512)
    txt = txt_ref[...].astype(jnp.float32)               # (tb, 512)

    # Row-wise L2 normalize via rsqrt (EUP slot); the eps clamp protects
    # zero / unspecified (block-padding) rows from producing NaN.
    img_ss = jnp.maximum(jnp.sum(img * img, axis=-1, keepdims=True),
                         NORM_EPS * NORM_EPS)
    txt_ss = jnp.maximum(jnp.sum(txt * txt, axis=-1, keepdims=True),
                         NORM_EPS * NORM_EPS)
    img_n = (img * jax.lax.rsqrt(img_ss)).astype(jnp.bfloat16)
    txt_n = (txt * jax.lax.rsqrt(txt_ss)).astype(jnp.bfloat16)

    # Layer 1: concat-free — two accumulating matmuls, bf16 MXU inputs,
    # f32 accumulation.
    h = jnp.dot(img_n, w1a_ref[...], preferred_element_type=jnp.float32)
    h = h + jnp.dot(txt_n, w1b_ref[...], preferred_element_type=jnp.float32)
    h = jnp.maximum(h + b1_ref[...], 0.0)   # ReLU; Dropout(0.2) = id (inference)

    # Layer 2 (lane-dense, 128-padded output dim), bf16 writeback.
    y = jnp.dot(h.astype(jnp.bfloat16), w2_ref[...],
                preferred_element_type=jnp.float32)
    out_ref[...] = (y + b2_ref[...]).astype(out_ref.dtype)


def _batch_tile(B):
    """Batch tile: one block for tiny B; exactly two tiles for mid-size B
    (so both v7x TensorCores get work); 512-row tiles for large B."""
    if B <= MIN_SPLIT_B:
        return _round_up(max(B, 1), BATCH_ALIGN)
    if B <= 2 * BATCH_TILE:
        return _round_up(-(-B // 2), BATCH_ALIGN)
    return BATCH_TILE


@functools.partial(jax.jit, static_argnames=("out_dim",))
def _run_head(image_embeds, text_embeds, w1a, w1b, b1, w2p, b2p, *, out_dim):
    B = image_embeds.shape[0]
    out_pad = w2p.shape[1]

    # Upstream CLIP features should already be bf16 on TPU; no-op in that case.
    image_embeds = image_embeds.astype(jnp.bfloat16)
    text_embeds = text_embeds.astype(jnp.bfloat16)

    tile_b = _batch_tile(B)
    grid = (pl.cdiv(B, tile_b),)

    batch_spec = pl.BlockSpec((tile_b, EMBED_DIM), lambda i: (i, 0))

    def const(shape):
        # Constant block index across the grid -> VMEM-resident; single buffer.
        return pl.BlockSpec(shape, lambda i: (0, 0),
                            pipeline_mode=pl.Buffered(1))

    out_padded = pl.pallas_call(
        _head_kernel,
        out_shape=jax.ShapeDtypeStruct((B, out_pad), jnp.bfloat16),
        grid=grid,
        in_specs=[
            batch_spec,                          # image embeds (tile_b, 512) bf16
            batch_spec,                          # text embeds  (tile_b, 512) bf16
            const((EMBED_DIM, HIDDEN_DIM)),      # W1 image half (bf16)
            const((EMBED_DIM, HIDDEN_DIM)),      # W1 text half  (bf16)
            const((1, HIDDEN_DIM)),              # b1 (f32)
            const((HIDDEN_DIM, out_pad)),        # W2 padded     (bf16)
            const((1, out_pad)),                 # b2 padded (f32)
        ],
        out_specs=pl.BlockSpec((tile_b, out_pad), lambda i: (i, 0)),
        compiler_params=pltpu.CompilerParams(
            dimension_semantics=("parallel",)),
    )(image_embeds, text_embeds, w1a, w1b, b1, w2p, b2p)

    return out_padded[:, :out_dim].astype(jnp.float32)


def _init_head(key, out_dim):
    """nn.Linear-style init (uniform +/- 1/sqrt(fan_in)); weights pre-transposed
    to (in, out); W1 split into image/text halves; W2/b2 padded to lane width;
    matmul weights stored as bf16."""
    k1w, k1b, k2w, k2b = jax.random.split(key, 4)

    bound1 = 1.0 / jnp.sqrt(jnp.float32(FUSION_DIM))
    w1 = jax.random.uniform(k1w, (FUSION_DIM, HIDDEN_DIM), jnp.float32,
                            -bound1, bound1)
    b1 = jax.random.uniform(k1b, (1, HIDDEN_DIM), jnp.float32, -bound1, bound1)

    bound2 = 1.0 / jnp.sqrt(jnp.float32(HIDDEN_DIM))
    w2 = jax.random.uniform(k2w, (HIDDEN_DIM, out_dim), jnp.float32,
                            -bound2, bound2)
    b2 = jax.random.uniform(k2b, (1, out_dim), jnp.float32, -bound2, bound2)

    out_pad = _round_up(out_dim, LANE)
    w2p = jnp.zeros((HIDDEN_DIM, out_pad), jnp.float32).at[:, :out_dim].set(w2)
    b2p = jnp.zeros((1, out_pad), jnp.float32).at[:, :out_dim].set(b2)

    return dict(
        w1a=w1[:EMBED_DIM].astype(jnp.bfloat16),
        w1b=w1[EMBED_DIM:].astype(jnp.bfloat16),
        b1=b1,
        w2p=w2p.astype(jnp.bfloat16),
        b2p=b2p,
        out_dim=out_dim,
    )


class NutriVisionNetMultiHeadPallas:
    """JAX/Pallas re-implementation of the multi-head regression tail."""

    def __init__(self, food_nutrition_dim, fv_dim, fastfood_dim, key):
        keys = jax.random.split(key, 3)
        self.heads = {
            "food_nutrition": _init_head(keys[0], food_nutrition_dim),
            "fv": _init_head(keys[1], fv_dim),
            "fastfood": _init_head(keys[2], fastfood_dim),
        }

    def forward(self, image_embeds, text_embeds, source):
        if source not in self.heads:
            raise ValueError(f"Unknown source: {source}")
        p = self.heads[source]
        pred = _run_head(image_embeds, text_embeds,
                         p["w1a"], p["w1b"], p["b1"], p["w2p"], p["b2p"],
                         out_dim=p["out_dim"])
        # Caption would come from frozen BLIP generate(); not translated.
        caption = "<caption unavailable: BLIP not translated>"
        return pred, caption


def _reference(image_embeds, text_embeds, p):
    """Pure-JAX reference using the same (bf16-stored) weights in f32 math."""
    img = image_embeds.astype(jnp.float32)
    txt = text_embeds.astype(jnp.float32)
    img_n = img / jnp.maximum(
        jnp.linalg.norm(img, axis=-1, keepdims=True), NORM_EPS)
    txt_n = txt / jnp.maximum(
        jnp.linalg.norm(txt, axis=-1, keepdims=True), NORM_EPS)
    w1 = jnp.concatenate([p["w1a"].astype(jnp.float32),
                          p["w1b"].astype(jnp.float32)], axis=0)
    w2 = p["w2p"].astype(jnp.float32)[:, :p["out_dim"]]
    b2 = p["b2p"][:, :p["out_dim"]]
    fused = jnp.concatenate([img_n, txt_n], axis=-1)
    h = jnp.maximum(fused @ w1 + p["b1"], 0.0)
    return h @ w2 + b2


if __name__ == "__main__":
    key = jax.random.PRNGKey(0)
    k_model, k_img, k_txt = jax.random.split(key, 3)

    B = 2
    food_nutrition_dim, fv_dim, fastfood_dim = 16, 8, 12

    model = NutriVisionNetMultiHeadPallas(
        food_nutrition_dim, fv_dim, fastfood_dim, k_model)

    # Synthetic stand-ins for CLIP image / text features (B, 512); on TPU the
    # upstream encoders would emit bf16, so feed bf16 to the head directly.
    image_embeds = jax.random.normal(
        k_img, (B, EMBED_DIM), jnp.float32).astype(jnp.bfloat16)
    text_embeds = jax.random.normal(
        k_txt, (B, EMBED_DIM), jnp.float32).astype(jnp.bfloat16)

    ok = True
    for source in ("food_nutrition", "fv", "fastfood"):
        pred, _caption = model.forward(image_embeds, text_embeds, source)
        pred = jax.block_until_ready(pred)
        p = model.heads[source]
        ref = _reference(image_embeds, text_embeds, p)
        assert pred.shape == (B, p["out_dim"]), (pred.shape, p["out_dim"])
        # bf16 MXU inputs / bf16 output -> tolerate mixed-precision drift.
        ok &= bool(jnp.allclose(pred, ref, atol=2e-2, rtol=2e-2))

    if ok:
        print("KERNEL_OK")
</pallas_src>

<mosaic_0001>
module attributes {stable_mosaic.version = 11 : i64} {
  func.func @_head_kernel(%arg0: i32, %arg1: memref<16x512xbf16, #tpu.memory_space<vmem>>, %arg2: memref<16x512xbf16, #tpu.memory_space<vmem>>, %arg3: memref<512x512xbf16, #tpu.memory_space<vmem>>, %arg4: memref<512x512xbf16, #tpu.memory_space<vmem>>, %arg5: memref<1x512xf32, #tpu.memory_space<vmem>>, %arg6: memref<512x128xbf16, #tpu.memory_space<vmem>>, %arg7: memref<1x128xf32, #tpu.memory_space<vmem>>, %arg8: memref<16x128xbf16, #tpu.memory_space<vmem>>) attributes {dimension_semantics = [#tpu.dimension_semantics<parallel>], iteration_bounds = array<i64: 1>, scalar_prefetch = 0 : i64, scratch_operands = 0 : i64, tpu.core_type = #tpu.core_type<tc>, window_params = [{transform_indices = @transform_0, window_bounds = array<i64: 16, 512>}, {transform_indices = @transform_1, window_bounds = array<i64: 16, 512>}, {pipeline_mode = #tpu.pipeline_mode<synchronous>, transform_indices = @transform_2, window_bounds = array<i64: 512, 512>}, {pipeline_mode = #tpu.pipeline_mode<synchronous>, transform_indices = @transform_3, window_bounds = array<i64: 512, 512>}, {pipeline_mode = #tpu.pipeline_mode<synchronous>, transform_indices = @transform_4, window_bounds = array<i64: 1, 512>}, {pipeline_mode = #tpu.pipeline_mode<synchronous>, transform_indices = @transform_5, window_bounds = array<i64: 512, 128>}, {pipeline_mode = #tpu.pipeline_mode<synchronous>, transform_indices = @transform_6, window_bounds = array<i64: 1, 128>}, {transform_indices = @transform_7, window_bounds = array<i64: 16, 128>}]} {
    %c0 = arith.constant 0 : index
    %c0_0 = arith.constant 0 : index
    %0 = vector.load %arg1[%c0, %c0_0] : memref<16x512xbf16, #tpu.memory_space<vmem>>, vector<16x512xbf16>
    %1 = arith.extf %0 : vector<16x512xbf16> to vector<16x512xf32>
    %c0_1 = arith.constant 0 : index
    %c0_2 = arith.constant 0 : index
    %2 = vector.load %arg2[%c0_1, %c0_2] : memref<16x512xbf16, #tpu.memory_space<vmem>>, vector<16x512xbf16>
    %3 = arith.extf %2 : vector<16x512xbf16> to vector<16x512xf32>
    %4 = arith.mulf %1, %1 : vector<16x512xf32>
    %cst = arith.constant dense<0.000000e+00> : vector<16xf32>
    %5 = vector.multi_reduction <add>, %4, %cst [1] : vector<16x512xf32> to vector<16xf32>
    %6 = vector.shape_cast %5 : vector<16xf32> to vector<16x1xf32>
    %cst_3 = arith.constant 1.000000e-24 : f32
    %7 = vector.broadcast %cst_3 : f32 to vector<16x1xf32>
    %8 = arith.maximumf %6, %7 : vector<16x1xf32>
    %9 = arith.mulf %3, %3 : vector<16x512xf32>
    %cst_4 = arith.constant dense<0.000000e+00> : vector<16xf32>
    %10 = vector.multi_reduction <add>, %9, %cst_4 [1] : vector<16x512xf32> to vector<16xf32>
    %11 = vector.shape_cast %10 : vector<16xf32> to vector<16x1xf32>
    %cst_5 = arith.constant 1.000000e-24 : f32
    %12 = vector.broadcast %cst_5 : f32 to vector<16x1xf32>
    %13 = arith.maximumf %11, %12 : vector<16x1xf32>
    %14 = math.rsqrt %8 : vector<16x1xf32>
    %15 = vector.broadcast %14 : vector<16x1xf32> to vector<16x512xf32>
    %16 = arith.mulf %1, %15 : vector<16x512xf32>
    %17 = arith.truncf %16 : vector<16x512xf32> to vector<16x512xbf16>
    %18 = math.rsqrt %13 : vector<16x1xf32>
    %19 = vector.broadcast %18 : vector<16x1xf32> to vector<16x512xf32>
    %20 = arith.mulf %3, %19 : vector<16x512xf32>
    %21 = arith.truncf %20 : vector<16x512xf32> to vector<16x512xbf16>
    %c0_6 = arith.constant 0 : index
    %c0_7 = arith.constant 0 : index
    %22 = vector.load %arg3[%c0_6, %c0_7] : memref<512x512xbf16, #tpu.memory_space<vmem>>, vector<512x512xbf16>
    %cst_8 = arith.constant dense<0.000000e+00> : vector<16x512xf32>
    %23 = tpu.matmul %17, %22, %cst_8 {dimension_numbers = #tpu.dot_dimension_numbers<[1], [0], [0], [1], [0, 0, 1, 1], [], []>} : vector<16x512xbf16>, vector<512x512xbf16>, vector<16x512xf32> -> vector<16x512xf32>
    %c0_9 = arith.constant 0 : index
    %c0_10 = arith.constant 0 : index
    %24 = vector.load %arg4[%c0_9, %c0_10] : memref<512x512xbf16, #tpu.memory_space<vmem>>, vector<512x512xbf16>
    %cst_11 = arith.constant dense<0.000000e+00> : vector<16x512xf32>
    %25 = tpu.matmul %21, %24, %cst_11 {dimension_numbers = #tpu.dot_dimension_numbers<[1], [0], [0], [1], [0, 0, 1, 1], [], []>} : vector<16x512xbf16>, vector<512x512xbf16>, vector<16x512xf32> -> vector<16x512xf32>
    %26 = arith.addf %23, %25 : vector<16x512xf32>
    %c0_12 = arith.constant 0 : index
    %c0_13 = arith.constant 0 : index
    %27 = vector.load %arg5[%c0_12, %c0_13] : memref<1x512xf32, #tpu.memory_space<vmem>>, vector<1x512xf32>
    %28 = vector.broadcast %27 : vector<1x512xf32> to vector<16x512xf32>
    %29 = arith.addf %26, %28 : vector<16x512xf32>
    %cst_14 = arith.constant 0.000000e+00 : f32
    %30 = vector.broadcast %cst_14 : f32 to vector<16x512xf32>
    %31 = arith.maximumf %29, %30 : vector<16x512xf32>
    %32 = arith.truncf %31 : vector<16x512xf32> to vector<16x512xbf16>
    %c0_15 = arith.constant 0 : index
    %c0_16 = arith.constant 0 : index
    %33 = vector.load %arg6[%c0_15, %c0_16] : memref<512x128xbf16, #tpu.memory_space<vmem>>, vector<512x128xbf16>
    %cst_17 = arith.constant dense<0.000000e+00> : vector<16x128xf32>
    %34 = tpu.matmul %32, %33, %cst_17 {dimension_numbers = #tpu.dot_dimension_numbers<[1], [0], [0], [1], [0, 0, 1, 1], [], []>} : vector<16x512xbf16>, vector<512x128xbf16>, vector<16x128xf32> -> vector<16x128xf32>
    %c0_18 = arith.constant 0 : index
    %c0_19 = arith.constant 0 : index
    %35 = vector.load %arg7[%c0_18, %c0_19] : memref<1x128xf32, #tpu.memory_space<vmem>>, vector<1x128xf32>
    %36 = vector.broadcast %35 : vector<1x128xf32> to vector<16x128xf32>
    %37 = arith.addf %34, %36 : vector<16x128xf32>
    %38 = arith.truncf %37 : vector<16x128xf32> to vector<16x128xbf16>
    %c0_20 = arith.constant 0 : index
    %c0_21 = arith.constant 0 : index
    %39 = vector.load %arg8[%c0_20, %c0_21] : memref<16x128xbf16, #tpu.memory_space<vmem>>, vector<16x128xbf16>
    tpu.vector_store %arg8[%c0_20, %c0_21], %38 {strides = array<i32>} : memref<16x128xbf16, #tpu.memory_space<vmem>>, vector<16x128xbf16>,
    return
  }
  func.func @transform_0(%arg0: i32) -> (i32, i32) {
    %c0_i32 = arith.constant 0 : i32
    %c0_i32_0 = arith.constant 0 : i32
    return %arg0, %c0_i32 : i32, i32
  }
  func.func @transform_1(%arg0: i32) -> (i32, i32) {
    %c0_i32 = arith.constant 0 : i32
    %c0_i32_0 = arith.constant 0 : i32
    return %arg0, %c0_i32 : i32, i32
  }
  func.func @transform_2(%arg0: i32) -> (i32, i32) {
    %c0_i32 = arith.constant 0 : i32
    %c0_i32_0 = arith.constant 0 : i32
    %c0_i32_1 = arith.constant 0 : i32
    return %c0_i32, %c0_i32_0 : i32, i32
  }
  func.func @transform_3(%arg0: i32) -> (i32, i32) {
    %c0_i32 = arith.constant 0 : i32
    %c0_i32_0 = arith.constant 0 : i32
    %c0_i32_1 = arith.constant 0 : i32
    return %c0_i32, %c0_i32_0 : i32, i32
  }
  func.func @transform_4(%arg0: i32) -> (i32, i32) {
    %c0_i32 = arith.constant 0 : i32
    %c0_i32_0 = arith.constant 0 : i32
    %c0_i32_1 = arith.constant 0 : i32
    return %c0_i32, %c0_i32_0 : i32, i32
  }
  func.func @transform_5(%arg0: i32) -> (i32, i32) {
    %c0_i32 = arith.constant 0 : i32
    %c0_i32_0 = arith.constant 0 : i32
    %c0_i32_1 = arith.constant 0 : i32
    return %c0_i32, %c0_i32_0 : i32, i32
  }
  func.func @transform_6(%arg0: i32) -> (i32, i32) {
    %c0_i32 = arith.constant 0 : i32
    %c0_i32_0 = arith.constant 0 : i32
    %c0_i32_1 = arith.constant 0 : i32
    return %c0_i32, %c0_i32_0 : i32, i32
  }
  func.func @transform_7(%arg0: i32) -> (i32, i32) {
    %c0_i32 = arith.constant 0 : i32
    %c0_i32_0 = arith.constant 0 : i32
    return %arg0, %c0_i32 : i32, i32
  }
}

</mosaic_0001>

<bundles_post_ra>
// kernel: _run_head.1
= control target key start
LH: loop header
LB: loop body
LE: loop exit
PB: predicated region body
PF: predicated region fallthrough
CT: control target
= control target key end

     0   :  { %12 = vsyncpa [#allocation3], 0  ;;  %s4325_s0 = inlined_call_operand.hbm [shape: bf16[2,512], index: 0, kind: input, shape index: {}]   ;;  %s4326_s1 = inlined_call_operand.hbm [shape: bf16[2,512], index: 1, kind: input, shape index: {}]   ;;  %s4327_s2 = inlined_call_operand.hbm [shape: bf16[512,512], index: 2, kind: input, shape index: {}]   ;;  %s4328_s3 = inlined_call_operand.hbm [shape: bf16[512,512], index: 3, kind: input, shape index: {}]   ;;  %s4329_s4 = inlined_call_operand.vmem [shape: f32[1,512], index: 4, kind: input, shape index: {}]   ;;  %s4330_s5 = inlined_call_operand.hbm [shape: bf16[512,128], index: 5, kind: input, shape index: {}]   ;;  %s4331_s6 = inlined_call_operand.vmem [shape: f32[1,128], index: 6, kind: input, shape index: {}]   ;;  %s4332_s7 = inlined_call_operand.vmem [shape: bf16[2,128], index: 7, kind: output, shape index: {}]  }
   0x1   :  { %13 = vsyncpa [#allocation5], 0 }
   0x2   :  { %14 = vsyncpa [#allocation8], 0 }
   0x3   :  { %19 = vsyncadd [#allocation3], 448  ;;  %s4010_s24 = smov [#allocation2]   ;;  %s3894_s28 = scalar_lea.hbm %s4325_s0, 64 }
   0x4   :  { %s20_s25 = sshll.u32 %s4010_s24, 4  ;;  %p3895_p0 = scmp.ne.s32.totalorder %s4325_s0, %s3894_s28  ;;  %s21_s25 = int_to_ptr.vmem [resolvable:$true] %s20_s25 }
   0x5   :  { %p3898_p1 = scmp.lt.u32.totalorder %s3894_s28, %s4325_s0 }
   0x7   :  { %p3900_p2 = pnand %p3898_p1, %p3895_p0 }
   0x9   :  { %3903 = shalt.err (!%p3900_p2)
}
   0xa   :  { %s3904_s10 = scalar_lea.vmem %s21_s25, 64  ;;  %s3908_s11 = scalar_lea.vmem %s21_s25, 512 }
   0xb   :  { %p3905_p3 = scmp.ne.s32.totalorder %s21_s25, %s3904_s10  ;;  %p3909_p4 = scmp.lt.s32.totalorder %s21_s25, %s21_s25 }
   0xc   :  { %p3910_p5 = scmp.lt.s32.totalorder %s3908_s11, %s3904_s10 }
   0xe   :  { %p3911_p6 = por %p3910_p5, %p3909_p4 }
  0x10   :  { %p3912_p7 = pnand %p3911_p6, %p3905_p3 }
  0x12   :  { %3915 = shalt.err (!%p3912_p7)
}
  0x13   :  { %s4011_s12 = smov 64   ;;  %s4012_s13 = smov 4  }
  0x14   :  { %26 = dma.hbm_to_vmem [thread:$0]  %s4325_s0, 64, %s21_s25, [#allocation3], %s4011_s12, %s4011_s12, %s4012_s13  }
  0x15   :  { %31 = vsyncadd [#allocation5], 448  ;;  %s4013_s16 = smov [#allocation4]   ;;  %s3916_s20 = scalar_lea.hbm %s4326_s1, 64 }
  0x16   :  { %s32_s17 = sshll.u32 %s4013_s16, 4  ;;  %p3917_p8 = scmp.ne.s32.totalorder %s4326_s1, %s3916_s20  ;;  %s33_s17 = int_to_ptr.vmem [resolvable:$true] %s32_s17 }
  0x17   :  { %p3920_p9 = scmp.lt.u32.totalorder %s3916_s20, %s4326_s1 }
  0x19   :  { %p3922_p10 = pnand %p3920_p9, %p3917_p8 }
  0x1b   :  { %3925 = shalt.err (!%p3922_p10)
}
  0x1c   :  { %s3926_s26 = scalar_lea.vmem %s33_s17, 64  ;;  %s3930_s0 = scalar_lea.vmem %s33_s17, 512 }
  0x1d   :  { %p3927_p11 = scmp.ne.s32.totalorder %s33_s17, %s3926_s26  ;;  %p3931_p12 = scmp.lt.s32.totalorder %s33_s17, %s33_s17 }
  0x1e   :  { %p3932_p13 = scmp.lt.s32.totalorder %s3930_s0, %s3926_s26 }
  0x20   :  { %p3933_p0 = por %p3932_p13, %p3931_p12 }
  0x22   :  { %p3934_p1 = pnand %p3933_p0, %p3927_p11 }
  0x24   :  { %3937 = shalt.err (!%p3934_p1)
}
  0x25   :  { %38 = dma.hbm_to_vmem [thread:$0]  %s4326_s1, 64, %s33_s17, [#allocation5], %s4011_s12, %s4011_s12, %s4012_s13  }
  0x26   :  { %s4014_s28 = smov [#allocation7]   ;;  %s4015_s30 = smov [#allocation6]  }
  0x27   :  { %s56_s29 = sshll.u32 %s4014_s28, 4  ;;  %s44_s8 = sshll.u32 %s4015_s30, 4  ;;  %s57_s29 = int_to_ptr.vmem [resolvable:$true] %s56_s29  ;;  %s45_s8 = int_to_ptr.vmem [resolvable:$true] %s44_s8 }
  0x28   :  { %s3938_s11 = scalar_lea.hbm %s4328_s3, 16384 }
  0x29   :  { %p3939_p2 = scmp.ne.s32.totalorder %s4328_s3, %s3938_s11  ;;  %p3942_p3 = scmp.lt.u32.totalorder %s3938_s11, %s4328_s3 }
  0x2b   :  { %p3944_p4 = pnand %p3942_p3, %p3939_p2 }
  0x2d   :  { %3947 = shalt.err (!%p3944_p4)
}
  0x2e   :  { %s3948_s1 = scalar_lea.vmem %s57_s29, 16384  ;;  %p3953_p6 = scmp.lt.s32.totalorder %s57_s29, %s57_s29 }
  0x2f   :  { %p3949_p5 = scmp.ne.s32.totalorder %s57_s29, %s3948_s1  ;;  %p3954_p7 = scmp.lt.s32.totalorder %s3948_s1, %s3948_s1 }
  0x31   :  { %p3955_p8 = por %p3954_p7, %p3953_p6 }
  0x33   :  { %p3956_p9 = pnand %p3955_p8, %p3949_p5 }
  0x35   :  { %3959 = shalt.err (!%p3956_p9)
}
  0x36   :  { %s4016_s17 = smov 256   ;;  %s4017_s19 = smov 16  }
  0x37   :  { %62 = dma.hbm_to_vmem [thread:$0]  %s4328_s3, 16384, %s57_s29, [#allocation8], %s4016_s17, %s4016_s17, %s4017_s19  }
  0x38   :  { %s3960_s24 = scalar_lea.hbm %s4327_s2, 16384 }
  0x39   :  { %p3961_p10 = scmp.ne.s32.totalorder %s4327_s2, %s3960_s24  ;;  %p3964_p11 = scmp.lt.u32.totalorder %s3960_s24, %s4327_s2 }
  0x3b   :  { %p3966_p12 = pnand %p3964_p11, %p3961_p10 }
  0x3d   :  { %3969 = shalt.err (!%p3966_p12)
}
  0x3e   :  { %s3970_s28 = scalar_lea.vmem %s45_s8, 16384  ;;  %p3975_p0 = scmp.lt.s32.totalorder %s45_s8, %s45_s8 }
  0x3f   :  { %p3971_p13 = scmp.ne.s32.totalorder %s45_s8, %s3970_s28  ;;  %p3976_p1 = scmp.lt.s32.totalorder %s3970_s28, %s3970_s28 }
  0x41   :  { %p3977_p2 = por %p3976_p1, %p3975_p0 }
  0x43   :  { %p3978_p3 = pnand %p3977_p2, %p3971_p13 }
  0x45   :  { %3981 = shalt.err (!%p3978_p3)
}
  0x46   :  { %50 = dma.hbm_to_vmem [thread:$0]  %s4327_s2, 16384, %s45_s8, [#allocation5], %s4016_s17, %s4016_s17, %s4017_s19  }
  0x47   :  { %s4018_s30 = smov [#allocation9]   ;;  %s3982_s14 = scalar_lea.hbm %s4330_s5, 4096 }
  0x48   :  { %s70_s9 = sshll.u32 %s4018_s30, 4  ;;  %p3983_p4 = scmp.ne.s32.totalorder %s4330_s5, %s3982_s14  ;;  %s71_s9 = int_to_ptr.vmem [resolvable:$true] %s70_s9 }
  0x49   :  { %p3986_p5 = scmp.lt.u32.totalorder %s3982_s14, %s4330_s5 }
  0x4b   :  { %p3988_p6 = pnand %p3986_p5, %p3983_p4 }
  0x4d   :  { %3991 = shalt.err (!%p3988_p6)
}
  0x4e   :  { %s3992_s20 = scalar_lea.vmem %s71_s9, 4096  ;;  %p3997_p8 = scmp.lt.s32.totalorder %s71_s9, %s71_s9 }
  0x4f   :  { %p3993_p7 = scmp.ne.s32.totalorder %s71_s9, %s3992_s20  ;;  %p3998_p9 = scmp.lt.s32.totalorder %s3992_s20, %s3992_s20 }
  0x51   :  { %p3999_p10 = por %p3998_p9, %p3997_p8 }
  0x53   :  { %p4000_p11 = pnand %p3999_p10, %p3993_p7 }
  0x55   :  { %4003 = shalt.err (!%p4000_p11)
}
  0x56   :  { %76 = dma.hbm_to_vmem [thread:$0]  %s4330_s5, 4096, %s71_s9, [#allocation8], %s4011_s12, %s4011_s12, %s4012_s13  }
  0x57   :  { %4004 = dma.done.wait [#allocation3], 512  }
  0x58   :  { %4005 = vsyncadd [#allocation3], 4294966784 }
  0x59   :  { %4006 = dma.done.wait [#allocation5], 16896  }
  0x5a   :  { %4007 = vsyncadd [#allocation5], 4294950400 }
  0x5b   :  { %4008 = dma.done.wait [#allocation8], 20480  }
  0x5c   :  { %4009 = vsyncadd [#allocation8], 4294946816  ;;  %v150_v0 = vlaneseq  ;;  %v4019_v1 = vmov 1983009808   ;;  %v3366_v5 = vld [vmem:[#allocation4] sm:$0xff]   ;;  %v3384_v6 = vld [vmem:[#allocation4 + $0x8] sm:$0xff]  }
  0x5d   :  { %v148_v2 = vunpack.c.l.s4 %v4019_v1  ;;  %v3385_v8 = vld [vmem:[#allocation4 + $0x10] sm:$0xff]   ;;  %v4139_v9 = vunpack.c.l.bf16 %v3366_v5  ;;  %v4141_v10 = vunpack.c.h.bf16 %v3366_v5  ;;  %v4143_v11 = vunpack.c.l.bf16 %v3384_v6  ;;  %v3386_v13 = vld [vmem:[#allocation4 + $0x18] sm:$0xff]  }
  0x5e   :  { %v4134_v4 = vshrl.u32 %v150_v0, 7  ;;  %v4145_v12 = vunpack.c.h.bf16 %v3384_v6  ;;  %v4147_v14 = vunpack.c.l.bf16 %v3385_v8  ;;  %v4149_v15 = vunpack.c.h.bf16 %v3385_v8  ;;  %v3470_v18 = vld [vmem:[#allocation7 + $0x4] ss:$16 sps:$4 sm:$0xff]   ;;  %v3472_v23 = vld [vmem:[#allocation7 + $0xc] ss:$16 sps:$4 sm:$0xff]  }
  0x5f   :  { %v149_v3 = vunpack.c.0.s8 %v148_v2  ;;  %v4151_v16 = vunpack.c.l.bf16 %v3386_v13  ;;  %v4153_v17 = vunpack.c.h.bf16 %v3386_v13  ;;  %v235_v19 = vmul.f32 %v4139_v9, %v4139_v9  ;;  %v3474_v24 = vld [vmem:[#allocation7] ss:$16 sps:$4 sm:$0xff]   ;;  %v3475_v25 = vld [vmem:[#allocation7 + $0x8] ss:$16 sps:$4 sm:$0xff]   ;;  %1575 = vmatprep.subr.bf16.mxu0 %v3470_v18  ;;  %v3476_v30 = vld [vmem:[#allocation7 + $0x24] ss:$16 sps:$4 sm:$0xff]   ;;  %1661 = vmatprep.subr.bf16.mxu1 %v3472_v23 }
  0x60   :  { %v236_v20 = vmul.f32 %v4141_v10, %v4141_v10  ;;  %v237_v21 = vmul.f32 %v4143_v11, %v4143_v11  ;;  %v238_v22 = vmul.f32 %v4145_v12, %v4145_v12  ;;  %v239_v26 = vmul.f32 %v4147_v14, %v4147_v14  ;;  %v3478_v35 = vld [vmem:[#allocation7 + $0x2c] ss:$16 sps:$4 sm:$0xff]   ;;  %1576 = vmatpush1.bf16.msra.mxu0 %v3474_v24  ;;  %v3480_v40 = vld [vmem:[#allocation7 + $0x20] ss:$16 sps:$4 sm:$0xff]   ;;  %v3481_v41 = vld [vmem:[#allocation7 + $0x28] ss:$16 sps:$4 sm:$0xff]  }
  0x61   :  { %v4137_v7 = vsub.s32 %v149_v3, %v4134_v4  ;;  %v240_v27 = vmul.f32 %v4149_v15, %v4149_v15  ;;  %v241_v28 = vmul.f32 %v4151_v16, %v4151_v16  ;;  %v242_v29 = vmul.f32 %v4153_v17, %v4153_v17  ;;  %1662 = vmatpush1.bf16.msra.mxu1 %v3475_v25  ;;  %v3482_v46 = vld [vmem:[#allocation7 + $0x44] ss:$16 sps:$4 sm:$0xff]   ;;  %v3484_v51 = vld [vmem:[#allocation7 + $0x4c] ss:$16 sps:$4 sm:$0xff]   ;;  %v3486_v58 = vld [vmem:[#allocation7 + $0x40] ss:$16 sps:$4 sm:$0xff]  }
  0x62   :  { %v251_v31 = vcombine.low %v235_v19, %v236_v20  ;;  %v252_v32 = vcombine.high %v235_v19, %v236_v20  ;;  %v253_v33 = vcombine.low %v237_v21, %v238_v22  ;;  %v254_v34 = vcombine.high %v237_v21, %v238_v22  ;;  %1577 = vmatprep.subr.bf16.mxu0 %v3476_v30  ;;  %v3487_v61 = vld [vmem:[#allocation7 + $0x48] ss:$16 sps:$4 sm:$0xff]   ;;  %v3488_v62 = vld [vmem:[#allocation7 + $0x64] ss:$16 sps:$4 sm:$0xff]   ;;  %v3490_v0 = vld [vmem:[#allocation7 + $0x6c] ss:$16 sps:$4 sm:$0xff]  }
  0x63   :  { %v287_v36 = vcombine.low %v239_v26, %v240_v27  ;;  %v288_v37 = vcombine.high %v239_v26, %v240_v27  ;;  %v289_v38 = vcombine.low %v241_v28, %v242_v29  ;;  %v290_v39 = vcombine.high %v241_v28, %v242_v29  ;;  %1663 = vmatprep.subr.bf16.mxu1 %v3478_v35  ;;  %v3492_v3 = vld [vmem:[#allocation7 + $0x60] ss:$16 sps:$4 sm:$0xff]   ;;  %v3493_v6 = vld [vmem:[#allocation7 + $0x68] ss:$16 sps:$4 sm:$0xff]   ;;  %v3494_v8 = vld [vmem:[#allocation7 + $0x84] ss:$16 sps:$4 sm:$0xff]  }
  0x64   :  { %v261_v42 = vrot.slane %v251_v31, %v4137_v7  ;;  %v268_v43 = vrot.slane %v252_v32, %v4137_v7  ;;  %v275_v44 = vrot.slane %v253_v33, %v4137_v7  ;;  %v282_v45 = vrot.slane %v254_v34, %v4137_v7  ;;  %1578 = vmatpush1.bf16.msra.mxu0 %v3480_v40  ;;  %v3350_v13 = vld [vmem:[#allocation2] sm:$0xff]   ;;  %v3381_v21 = vld [vmem:[#allocation2 + $0x8] sm:$0xff]   ;;  %v3382_v32 = vld [vmem:[#allocation2 + $0x10] sm:$0xff]  }
  0x65   :  { %v297_v47 = vrot.slane %v287_v36, %v4137_v7  ;;  %v304_v48 = vrot.slane %v288_v37, %v4137_v7  ;;  %v311_v49 = vrot.slane %v289_v38, %v4137_v7  ;;  %v318_v50 = vrot.slane %v290_v39, %v4137_v7  ;;  %1664 = vmatpush1.bf16.msra.mxu1 %v3481_v41  ;;  %v3496_v22 = vld [vmem:[#allocation7 + $0x8c] ss:$16 sps:$4 sm:$0xff]   ;;  %v3498_v26 = vld [vmem:[#allocation7 + $0x80] ss:$16 sps:$4 sm:$0xff]   ;;  %v3499_v27 = vld [vmem:[#allocation7 + $0x88] ss:$16 sps:$4 sm:$0xff]  }
  0x66   :  { %v283_v52 = vcombine.low %v261_v42, %v275_v44  ;;  %v284_v53 = vcombine.high %v261_v42, %v275_v44  ;;  %v285_v54 = vcombine.low %v268_v43, %v282_v45  ;;  %v286_v59 = vcombine.high %v268_v43, %v282_v45  ;;  %1579 = vmatprep.subr.bf16.mxu0 %v3482_v46  ;;  %v3383_v33 = vld [vmem:[#allocation2 + $0x18] sm:$0xff]   ;;  %v3500_v36 = vld [vmem:[#allocation7 + $0xa4] ss:$16 sps:$4 sm:$0xff]  }
  0x67   :  { %v319_v55 = vcombine.low %v297_v47, %v311_v49  ;;  %v320_v56 = vcombine.high %v297_v47, %v311_v49  ;;  %v321_v57 = vcombine.low %v304_v48, %v318_v50  ;;  %1665 = vmatprep.subr.bf16.mxu1 %v3484_v51  ;;  %v322_v2 = vcombine.high %v304_v48, %v318_v50  ;;  %v3502_v41 = vld [vmem:[#allocation7 + $0xac] ss:$16 sps:$4 sm:$0xff]   ;;  %v3504_v50 = vld [vmem:[#allocation7 + $0xa0] ss:$16 sps:$4 sm:$0xff]  }
  0x68   :  { %v331_v60 = vadd.f32 %v284_v53, %v283_v52  ;;  %1580 = vmatpush1.bf16.msra.mxu0 %v3486_v58  ;;  %v4179_v19 = vunpack.c.l.bf16 %v3350_v13  ;;  %v4181_v20 = vunpack.c.h.bf16 %v3350_v13  ;;  %v4183_v23 = vunpack.c.l.bf16 %v3381_v21  ;;  %v3505_v53 = vld [vmem:[#allocation7 + $0xa8] ss:$16 sps:$4 sm:$0xff]  }
  0x69   :  { %v336_v63 = vadd.f32 %v320_v56, %v319_v55  ;;  %1666 = vmatpush1.bf16.msra.mxu1 %v3487_v61  ;;  %1581 = vmatprep.subr.bf16.mxu0 %v3488_v62  ;;  %v4185_v24 = vunpack.c.h.bf16 %v3381_v21  ;;  %v4195_v37 = vunpack.c.l.bf16 %v3382_v32  ;;  %v4197_v38 = vunpack.c.h.bf16 %v3382_v32  ;;  %v3506_v56 = vld [vmem:[#allocation7 + $0xc4] ss:$16 sps:$4 sm:$0xff]   ;;  %v3510_v61 = vld [vmem:[#allocation7 + $0xc0] ss:$16 sps:$4 sm:$0xff]  }
  0x6a   :  { %v332_v1 = vadd.f32 %v331_v60, %v285_v54  ;;  %1667 = vmatprep.subr.bf16.mxu1 %v3490_v0  ;;  %v127_v28 = vmul.f32 %v4179_v19, %v4179_v19  ;;  %v128_v29 = vmul.f32 %v4181_v20, %v4181_v20  ;;  %v129_v30 = vmul.f32 %v4183_v23, %v4183_v23  ;;  %v3518_v32 = vld [vmem:[#allocation7 + $0x104] ss:$16 sps:$4 sm:$0xff]  }
  0x6b   :  { %v337_v5 = vadd.f32 %v336_v63, %v321_v57  ;;  %v130_v31 = vmul.f32 %v4185_v24, %v4185_v24  ;;  %v4199_v42 = vunpack.c.l.bf16 %v3383_v33  ;;  %v4201_v43 = vunpack.c.h.bf16 %v3383_v33  ;;  %v3508_v57 = vld [vmem:[#allocation7 + $0xcc] ss:$16 sps:$4 sm:$0xff]  }
  0x6c   :  { %v333_v18 = vadd.f32 %v332_v1, %v286_v59  ;;  %1582 = vmatpush1.bf16.msra.mxu0 %v3492_v3  ;;  %v143_v34 = vcombine.low %v127_v28, %v128_v29  ;;  %v144_v35 = vcombine.high %v127_v28, %v128_v29  ;;  %v131_v46 = vmul.f32 %v4195_v37, %v4195_v37  ;;  %v3516_v28 = vld [vmem:[#allocation7 + $0xe0] ss:$16 sps:$4 sm:$0xff]   ;;  %v3517_v29 = vld [vmem:[#allocation7 + $0xe8] ss:$16 sps:$4 sm:$0xff]   ;;  %v3520_v33 = vld [vmem:[#allocation7 + $0x10c] ss:$16 sps:$4 sm:$0xff]  }
  0x6d   :  { %v338_v25 = vadd.f32 %v337_v5, %v322_v2  ;;  %1668 = vmatpush1.bf16.msra.mxu1 %v3493_v6  ;;  %1583 = vmatprep.subr.bf16.mxu0 %v3494_v8  ;;  %v145_v39 = vcombine.low %v129_v30, %v130_v31  ;;  %v146_v40 = vcombine.high %v129_v30, %v130_v31  ;;  %v3511_v2 = vld [vmem:[#allocation7 + $0xc8] ss:$16 sps:$4 sm:$0xff]   ;;  %v3512_v6 = vld [vmem:[#allocation7 + $0xe4] ss:$16 sps:$4 sm:$0xff]   ;;  %v3514_v8 = vld [vmem:[#allocation7 + $0xec] ss:$16 sps:$4 sm:$0xff]  }
  0x6e   :  { %334 = vadd.xlane.f32.xlu0 %v333_v18  ;;  %1669 = vmatprep.subr.bf16.mxu1 %v3496_v22  ;;  %v153_v44 = vrot.slane %v143_v34, %v4137_v7  ;;  %v160_v45 = vrot.slane %v144_v35, %v4137_v7  ;;  %v132_v47 = vmul.f32 %v4197_v38, %v4197_v38  ;;  %v3522_v35 = vld [vmem:[#allocation7 + $0x100] ss:$16 sps:$4 sm:$0xff]  }
  0x6f   :  { %v167_v48 = vrot.slane %v145_v39, %v4137_v7  ;;  %v174_v49 = vrot.slane %v146_v40, %v4137_v7  ;;  %v133_v51 = vmul.f32 %v4199_v42, %v4199_v42  ;;  %v134_v52 = vmul.f32 %v4201_v43, %v4201_v43  ;;  %v3524_v40 = vld [vmem:[#allocation7 + $0x124] ss:$16 sps:$4 sm:$0xff]  }
  0x70   :  { %1584 = vmatpush1.bf16.msra.mxu0 %v3498_v26  ;;  %v179_v54 = vcombine.low %v131_v46, %v132_v47  ;;  %v180_v55 = vcombine.high %v131_v46, %v132_v47  ;;  %v3530_v46 = vld [vmem:[#allocation7 + $0x144] ss:$16 sps:$4 sm:$0xff]   ;;  %v3532_v47 = vld [vmem:[#allocation7 + $0x14c] ss:$16 sps:$4 sm:$0xff]  }
  0x71   :  { %1670 = vmatpush1.bf16.msra.mxu1 %v3499_v27  ;;  %1585 = vmatprep.subr.bf16.mxu0 %v3500_v36  ;;  %v175_v58 = vcombine.low %v153_v44, %v167_v48  ;;  %v176_v59 = vcombine.high %v153_v44, %v167_v48  ;;  %v177_v60 = vcombine.low %v160_v45, %v174_v49  ;;  %v3523_v36 = vld [vmem:[#allocation7 + $0x108] ss:$16 sps:$4 sm:$0xff]   ;;  %v3528_v44 = vld [vmem:[#allocation7 + $0x120] ss:$16 sps:$4 sm:$0xff]  }
  0x72   :  { %339 = vadd.xlane.f32.xlu0 %v338_v25  ;;  %1671 = vmatprep.subr.bf16.mxu1 %v3502_v41  ;;  %v181_v62 = vcombine.low %v133_v51, %v134_v52  ;;  %v182_v63 = vcombine.high %v133_v51, %v134_v52  ;;  %v189_v0 = vrot.slane %v179_v54, %v4137_v7  ;;  %v3526_v41 = vld [vmem:[#allocation7 + $0x12c] ss:$16 sps:$4 sm:$0xff]   ;;  %v3534_v48 = vld [vmem:[#allocation7 + $0x140] ss:$16 sps:$4 sm:$0xff]   ;;  %v3542_v54 = vld [vmem:[#allocation7 + $0x184] ss:$16 sps:$4 sm:$0xff]  }
  0x73   :  { %v196_v1 = vrot.slane %v180_v55, %v4137_v7  ;;  %v178_v3 = vcombine.high %v160_v45, %v174_v49  ;;  %v223_v5 = vadd.f32 %v176_v59, %v175_v58  ;;  %v3529_v45 = vld [vmem:[#allocation7 + $0x128] ss:$16 sps:$4 sm:$0xff]   ;;  %v3538_v51 = vld [vmem:[#allocation7 + $0x16c] ss:$16 sps:$4 sm:$0xff]   ;;  %v3540_v52 = vld [vmem:[#allocation7 + $0x160] ss:$16 sps:$4 sm:$0xff]  }
  0x74   :  { %1586 = vmatpush1.bf16.msra.mxu0 %v3504_v50  ;;  %v203_v13 = vrot.slane %v181_v62, %v4137_v7  ;;  %v210_v18 = vrot.slane %v182_v63, %v4137_v7  ;;  %v3535_v49 = vld [vmem:[#allocation7 + $0x148] ss:$16 sps:$4 sm:$0xff]   ;;  %v3536_v50 = vld [vmem:[#allocation7 + $0x164] ss:$16 sps:$4 sm:$0xff]   ;;  %v3544_v55 = vld [vmem:[#allocation7 + $0x18c] ss:$16 sps:$4 sm:$0xff]  }
  0x75   :  { %1672 = vmatpush1.bf16.msra.mxu1 %v3505_v53  ;;  %1587 = vmatprep.subr.bf16.mxu0 %v3506_v56  ;;  %v224_v21 = vadd.f32 %v223_v5, %v177_v60  ;;  %v3541_v53 = vld [vmem:[#allocation7 + $0x168] ss:$16 sps:$4 sm:$0xff]   ;;  %v3546_v56 = vld [vmem:[#allocation7 + $0x180] ss:$16 sps:$4 sm:$0xff]   ;;  %v3548_v58 = vld [vmem:[#allocation7 + $0x1a4] ss:$16 sps:$4 sm:$0xff]  }
  0x76   :  { %1673 = vmatprep.subr.bf16.mxu1 %v3508_v57  ;;  %v211_v22 = vcombine.low %v189_v0, %v203_v13  ;;  %v212_v25 = vcombine.high %v189_v0, %v203_v13  ;;  %v213_v26 = vcombine.low %v196_v1, %v210_v18  ;;  %v214_v30 = vcombine.high %v196_v1, %v210_v18  ;;  %v3547_v57 = vld [vmem:[#allocation7 + $0x188] ss:$16 sps:$4 sm:$0xff]   ;;  %v3550_v59 = vld [vmem:[#allocation7 + $0x1ac] ss:$16 sps:$4 sm:$0xff]   ;;  %v3552_v60 = vld [vmem:[#allocation7 + $0x1a0] ss:$16 sps:$4 sm:$0xff]  }
  0x77   :  { %v225_v27 = vadd.f32 %v224_v21, %v178_v3  ;;  %v3554_v62 = vld [vmem:[#allocation7 + $0x1c4] ss:$16 sps:$4 sm:$0xff]   ;;  %v3556_v63 = vld [vmem:[#allocation7 + $0x1cc] ss:$16 sps:$4 sm:$0xff]   ;;  %v3558_v0 = vld [vmem:[#allocation7 + $0x1c0] ss:$16 sps:$4 sm:$0xff]  }
  0x78   :  { %1588 = vmatpush1.bf16.msra.mxu0 %v3510_v61  ;;  %v228_v31 = vadd.f32 %v212_v25, %v211_v22  ;;  %v3553_v61 = vld [vmem:[#allocation7 + $0x1a8] ss:$16 sps:$4 sm:$0xff]   ;;  %v3562_v3 = vld [vmem:[#allocation7 + $0x1ec] ss:$16 sps:$4 sm:$0xff]   ;;  %v3564_v5 = vld [vmem:[#allocation7 + $0x1e0] ss:$16 sps:$4 sm:$0xff]  }
  0x79   :  { %1674 = vmatpush1.bf16.msra.mxu1 %v3511_v2  ;;  %1589 = vmatprep.subr.bf16.mxu0 %v3512_v6  ;;  %v3559_v1 = vld [vmem:[#allocation7 + $0x1c8] ss:$16 sps:$4 sm:$0xff]   ;;  %v3560_v2 = vld [vmem:[#allocation7 + $0x1e4] ss:$16 sps:$4 sm:$0xff]   ;;  %v3571_v13 = vld [vmem:[#allocation7 + $0x20c] ss:$16 sps:$4 sm:$0xff]  }
  0x7a   :  { %226 = vadd.xlane.f32.xlu1 %v225_v27  ;;  %1675 = vmatprep.subr.bf16.mxu1 %v3514_v8  ;;  %v229_v34 = vadd.f32 %v228_v31, %v213_v26  ;;  %v3565_v6 = vld [vmem:[#allocation7 + $0x1e8] ss:$16 sps:$4 sm:$0xff]   ;;  %v3568_v8 = vld [vmem:[#allocation7 + $0x204] ss:$16 sps:$4 sm:$0xff]   ;;  %v4020_v22 = vmov 269488144  }
  0x7b   :  { %v348_v25 = vunpack.c.l.s4 %v4020_v22  ;;  %v4021_v26 = vmov 842150450  }
  0x7c   :  { %1590 = vmatpush1.bf16.msra.mxu0 %v3516_v28  ;;  %v230_v39 = vadd.f32 %v229_v34, %v214_v30  ;;  %v355_v27 = vunpack.c.l.s4 %v4021_v26  ;;  %v4022_v28 = vmov 1414812756   ;;  %v4023_v30 = vmov 1987475062  }
  0x7d   :  { %1676 = vmatpush1.bf16.msra.mxu1 %v3517_v29  ;;  %1591 = vmatprep.subr.bf16.mxu0 %v3518_v32  ;;  %v362_v29 = vunpack.c.l.s4 %v4022_v28  ;;  %v369_v31 = vunpack.c.l.s4 %v4023_v30  ;;  %v349_v34 = vunpack.c.0.s8 %v348_v25 }
  0x7e   :  { %1677 = vmatprep.subr.bf16.mxu1 %v3520_v33  ;;  %231 = vadd.xlane.f32.xlu1 %v230_v39 }
  0x7f   :  { %v370_v39 = vunpack.c.0.s8 %v369_v31 }
  0x80   :  { %1592 = vmatpush1.bf16.msra.mxu0 %v3522_v35  ;;  %v356_v35 = vunpack.c.0.s8 %v355_v27 }
  0x81   :  { %1678 = vmatpush1.bf16.msra.mxu1 %v3523_v36  ;;  %1593 = vmatprep.subr.bf16.mxu0 %v3524_v40  ;;  %v363_v36 = vunpack.c.0.s8 %v362_v29  ;;  %v4220_v40 = vsub.s32 %v349_v34, %v4134_v4 }
  0x82   :  { %1679 = vmatprep.subr.bf16.mxu1 %v3526_v41  ;;  %v4223_v41 = vsub.s32 %v356_v35, %v4134_v4 }
  0x84   :  { %1594 = vmatpush1.bf16.msra.mxu0 %v3528_v44  ;;  %v4226_v44 = vsub.s32 %v363_v36, %v4134_v4  ;;  %v3574_v36 = vld [vmem:[#allocation7 + $0x224] ss:$16 sps:$4 sm:$0xff]  }
  0x85   :  { %1680 = vmatpush1.bf16.msra.mxu1 %v3529_v45  ;;  %1595 = vmatprep.subr.bf16.mxu0 %v3530_v46  ;;  %v4229_v45 = vsub.s32 %v370_v39, %v4134_v4  ;;  %v3577_v39 = vld [vmem:[#allocation7 + $0x22c] ss:$16 sps:$4 sm:$0xff]  }
  0x86   :  { %1681 = vmatprep.subr.bf16.mxu1 %v3532_v47 }
  0x88   :  { %1596 = vmatpush1.bf16.msra.mxu0 %v3534_v48 }
  0x89   :  { %1682 = vmatpush1.bf16.msra.mxu1 %v3535_v49  ;;  %1597 = vmatprep.subr.bf16.mxu0 %v3536_v50 }
  0x8a   :  { %1683 = vmatprep.subr.bf16.mxu1 %v3538_v51 }
  0x8c   :  { %1598 = vmatpush1.bf16.msra.mxu0 %v3540_v52 }
  0x8d   :  { %1684 = vmatpush1.bf16.msra.mxu1 %v3541_v53  ;;  %1599 = vmatprep.subr.bf16.mxu0 %v3542_v54 }
  0x8e   :  { %1685 = vmatprep.subr.bf16.mxu1 %v3544_v55 }
  0x90   :  { %1600 = vmatpush1.bf16.msra.mxu0 %v3546_v56 }
  0x91   :  { %1686 = vmatpush1.bf16.msra.mxu1 %v3547_v57  ;;  %1601 = vmatprep.subr.bf16.mxu0 %v3548_v58 }
  0x92   :  { %1687 = vmatprep.subr.bf16.mxu1 %v3550_v59 }
  0x94   :  { %1602 = vmatpush1.bf16.msra.mxu0 %v3552_v60 }
  0x95   :  { %1688 = vmatpush1.bf16.msra.mxu1 %v3553_v61  ;;  %1603 = vmatprep.subr.bf16.mxu0 %v3554_v62 }
  0x96   :  { %1689 = vmatprep.subr.bf16.mxu1 %v3556_v63 }
  0x98   :  { %1604 = vmatpush1.bf16.msra.mxu0 %v3558_v0 }
  0x99   :  { %1690 = vmatpush1.bf16.msra.mxu1 %v3559_v1  ;;  %1605 = vmatprep.subr.bf16.mxu0 %v3560_v2 }
  0x9a   :  { %1691 = vmatprep.subr.bf16.mxu1 %v3562_v3 }
  0x9c   :  { %1606 = vmatpush1.bf16.msra.mxu0 %v3564_v5 }
  0x9d   :  { %1692 = vmatpush1.bf16.msra.mxu1 %v3565_v6  ;;  %1618 = vmatprep.subr.bf16.mxu0 %v3568_v8 }
  0x9e   :  { %1704 = vmatprep.subr.bf16.mxu1 %v3571_v13 }
  0xfb   :  { %v335_v18 = vpop.xlane.xlu0 %334 }
  0xfc   :  { %v341_v21 = vmax.f32 %v335_v18, 1e-24 }
  0xfe   :  { %3886 = vrsqrt.f32 %v341_v21 }
  0xff   :  { %v340_v32 = vpop.xlane.xlu0 %339 }
 0x100   :  { %v342_v33 = vmax.f32 %v340_v32, 1e-24  ;;  %v3566_v32 = vld [vmem:[#allocation7 + $0x200] ss:$16 sps:$4 sm:$0xff]  }
 0x102   :  { %3888 = vrsqrt.f32 %v342_v33  ;;  %v3569_v33 = vld [vmem:[#allocation7 + $0x208] ss:$16 sps:$4 sm:$0xff]  }
 0x107   :  { %v227_v55 = vpop.xlane.xlu1 %226 }
 0x108   :  { %v3887_v46 = vpop.eup %3886  ;;  %v233_v63 = vmax.f32 %v227_v55, 1e-24 }
 0x109   :  { %v521_v47 = vrot.slane %v3887_v46, %v4220_v40  ;;  %v528_v48 = vrot.slane %v3887_v46, %v4223_v41  ;;  %v535_v49 = vrot.slane %v3887_v46, %v4226_v44  ;;  %v542_v50 = vrot.slane %v3887_v46, %v4229_v45 }
 0x10a   :  { %3890 = vrsqrt.f32 %v233_v63 }
 0x10b   :  { %v579_v51 = vmul.f32 %v4139_v9, %v521_v47  ;;  %v580_v52 = vmul.f32 %v4141_v10, %v528_v48  ;;  %v581_v53 = vmul.f32 %v4143_v11, %v535_v49  ;;  %v582_v54 = vmul.f32 %v4145_v12, %v542_v50  ;;  %v232_v18 = vpop.xlane.xlu1 %231  ;;  %v3572_v47 = vld [vmem:[#allocation7 + $0x220] ss:$16 sps:$4 sm:$0xff]   ;;  %v3575_v48 = vld [vmem:[#allocation7 + $0x228] ss:$16 sps:$4 sm:$0xff]   ;;  %v3580_v49 = vld [vmem:[#allocation7 + $0x244] ss:$16 sps:$4 sm:$0xff]  }
 0x10c   :  { %v3889_v56 = vpop.eup %3888  ;;  %v234_v25 = vmax.f32 %v232_v18, 1e-24  ;;  %v3583_v50 = vld [vmem:[#allocation7 + $0x24c] ss:$16 sps:$4 sm:$0xff]  }
 0x10d   :  { %v549_v57 = vrot.slane %v3889_v56, %v4220_v40  ;;  %v556_v58 = vrot.slane %v3889_v56, %v4223_v41  ;;  %v563_v59 = vrot.slane %v3889_v56, %v4226_v44  ;;  %v570_v60 = vrot.slane %v3889_v56, %v4229_v45 }
 0x10e   :  { %v595_v61 = vcombine.low %v579_v51, %v580_v52  ;;  %v597_v62 = vcombine.low %v581_v53, %v582_v54  ;;  %v596_v2 = vcombine.high %v579_v51, %v580_v52  ;;  %v598_v3 = vcombine.high %v581_v53, %v582_v54  ;;  %v3578_v52 = vld [vmem:[#allocation7 + $0x240] ss:$16 sps:$4 sm:$0xff]   ;;  %v3581_v53 = vld [vmem:[#allocation7 + $0x248] ss:$16 sps:$4 sm:$0xff]  }
 0x10f   :  { %v583_v9 = vmul.f32 %v4147_v14, %v549_v57  ;;  %v584_v10 = vmul.f32 %v4149_v15, %v556_v58  ;;  %v585_v11 = vmul.f32 %v4151_v16, %v563_v59  ;;  %v586_v12 = vmul.f32 %v4153_v17, %v570_v60  ;;  %v3586_v58 = vld [vmem:[#allocation7 + $0x264] ss:$16 sps:$4 sm:$0xff]   ;;  %v3589_v59 = vld [vmem:[#allocation7 + $0x26c] ss:$16 sps:$4 sm:$0xff]  }
 0x110   :  { %v605_v0 = vrot.slane %v595_v61, %v4137_v7  ;;  %v619_v1 = vrot.slane %v597_v62, %v4137_v7  ;;  %v4258_v17 = vrot.slane %v596_v2, %v4137_v7  ;;  %v4261_v22 = vrot.slane %v598_v3, %v4137_v7  ;;  %v3587_v2 = vld [vmem:[#allocation7 + $0x268] ss:$16 sps:$4 sm:$0xff]  }
 0x111   :  { %v631_v5 = vcombine.low %v583_v9, %v584_v10  ;;  %v633_v6 = vcombine.low %v585_v11, %v586_v12  ;;  %v632_v8 = vcombine.high %v583_v9, %v584_v10  ;;  %v634_v13 = vcombine.high %v585_v11, %v586_v12 }
 0x112   :  { %v628_v26 = vcombine.high %v605_v0, %v619_v1  ;;  %v627_v28 = vcombine.low %v605_v0, %v619_v1  ;;  %3892 = vrsqrt.f32 %v234_v25  ;;  %v630_v35 = vcombine.high %v4258_v17, %v4261_v22  ;;  %v3584_v1 = vld [vmem:[#allocation7 + $0x260] ss:$16 sps:$4 sm:$0xff]  }
 0x113   :  { %v641_v21 = vrot.slane %v631_v5, %v4137_v7  ;;  %v655_v14 = vrot.slane %v633_v6, %v4137_v7  ;;  %v4252_v15 = vrot.slane %v632_v8, %v4137_v7  ;;  %v4255_v16 = vrot.slane %v634_v13, %v4137_v7 }
 0x114   :  { %v3891_v51 = vpop.eup %3890 }
 0x115   :  { %v664_v27 = vcombine.high %v641_v21, %v655_v14  ;;  %v663_v29 = vcombine.low %v641_v21, %v655_v14  ;;  %v666_v30 = vcombine.high %v4252_v15, %v4255_v16  ;;  %v353_v54 = vrot.slane %v3891_v51, %v4220_v40  ;;  %v3593_v21 = vld [vmem:[#allocation7 + $0x288] ss:$16 sps:$4 sm:$0xff]  }
 0x116   :  { %v360_v55 = vrot.slane %v3891_v51, %v4223_v41  ;;  %v367_v56 = vrot.slane %v3891_v51, %v4226_v44  ;;  %v374_v60 = vrot.slane %v3891_v51, %v4229_v45 }
 0x117   :  { %v676_v31 = vpack.c.bf16 %v664_v27, %v628_v26  ;;  %v675_v34 = vpack.c.bf16 %v663_v29, %v627_v28  ;;  %v678_v46 = vpack.c.bf16 %v666_v30, %v630_v35  ;;  %v411_v10 = vmul.f32 %v4179_v19, %v353_v54  ;;  %v3595_v19 = vld [vmem:[#allocation7 + $0x28c] ss:$16 sps:$4 sm:$0xff]   ;;  %v3598_v26 = vld [vmem:[#allocation7 + $0x2a4] ss:$16 sps:$4 sm:$0xff]   ;;  %v3602_v54 = vld [vmem:[#allocation7 + $0x2c0] ss:$16 sps:$4 sm:$0xff]  }
 0x118   :  { %v412_v11 = vmul.f32 %v4181_v20, %v360_v55  ;;  %v413_v12 = vmul.f32 %v4183_v23, %v367_v56  ;;  %v414_v0 = vmul.f32 %v4185_v24, %v374_v60  ;;  %v3601_v27 = vld [vmem:[#allocation7 + $0x2ac] ss:$16 sps:$4 sm:$0xff]   ;;  %v3605_v55 = vld [vmem:[#allocation7 + $0x2c8] ss:$16 sps:$4 sm:$0xff]   ;;  %v3610_v56 = vld [vmem:[#allocation7 + $0x2e4] ss:$16 sps:$4 sm:$0xff]  }
 0x119   :  { %1607 = vmatprep.mubr.bf16.mxu0 %v676_v31  ;;  %1693 = vmatprep.mubr.bf16.mxu1 %v676_v31  ;;  %v3616_v60 = vld [vmem:[#allocation7 + $0x304] ss:$16 sps:$4 sm:$0xff]  }
 0x11a   :  { %1608 = vmatmul.mubr.bf16.vlgmr.msra.gmra.mrb[0].mxu0 %v675_v34  ;;  %1694 = vmatmul.mubr.bf16.vlgmr.msra.gmra.mrb[0].mxu1 %v675_v34  ;;  %v427_v3 = vcombine.low %v411_v10, %v412_v11  ;;  %v429_v23 = vcombine.low %v413_v12, %v414_v0  ;;  %v428_v24 = vcombine.high %v411_v10, %v412_v11  ;;  %v3625_v10 = vld [vmem:[#allocation7 + $0x32c] ss:$16 sps:$4 sm:$0xff]   ;;  %v3620_v11 = vld [vmem:[#allocation7 + $0x320] ss:$16 sps:$4 sm:$0xff]  }
 0x11b   :  { %1619 = vmatpush1.bf16.msra.mxu0 %v3566_v32  ;;  %1705 = vmatpush1.bf16.msra.mxu1 %v3569_v33  ;;  %v430_v6 = vcombine.high %v413_v12, %v414_v0  ;;  %v3623_v12 = vld [vmem:[#allocation7 + $0x328] ss:$16 sps:$4 sm:$0xff]   ;;  %v3628_v0 = vld [vmem:[#allocation7 + $0x344] ss:$16 sps:$4 sm:$0xff]  }
 0x11c   :  { %1650 = vmatprep.mubr.bf16.mxu0 %v678_v46  ;;  %1736 = vmatprep.mubr.bf16.mxu1 %v678_v46  ;;  %v3893_v57 = vpop.eup %3892  ;;  %v437_v13 = vrot.slane %v427_v3, %v4137_v7  ;;  %v3599_v46 = vld [vmem:[#allocation7 + $0x2a8] ss:$16 sps:$4 sm:$0xff]   ;;  %v3643_v3 = vld [vmem:[#allocation7 + $0x38c] ss:$16 sps:$4 sm:$0xff]  }
 0x11d   :  { %1620 = vmatprep.subr.bf16.mxu0 %v3574_v36  ;;  %1706 = vmatprep.subr.bf16.mxu1 %v3577_v39  ;;  %v381_v61 = vrot.slane %v3893_v57, %v4220_v40  ;;  %v388_v62 = vrot.slane %v3893_v57, %v4223_v41  ;;  %v395_v63 = vrot.slane %v3893_v57, %v4226_v44  ;;  %v3596_v39 = vld [vmem:[#allocation7 + $0x2a0] ss:$16 sps:$4 sm:$0xff]  }
 0x11e   :  { %v402_v9 = vrot.slane %v3893_v57, %v4229_v45  ;;  %v3592_v45 = vld [vmem:[#allocation7 + $0x284] ss:$16 sps:$4 sm:$0xff]   ;;  %v458_v25 = vrot.slane %v430_v6, %v4137_v7  ;;  %v3613_v57 = vld [vmem:[#allocation7 + $0x2ec] ss:$16 sps:$4 sm:$0xff]  }
 0x11f   :  { %1621 = vmatpush1.bf16.msra.mxu0 %v3572_v47  ;;  %1707 = vmatpush1.bf16.msra.mxu1 %v3575_v48  ;;  %v415_v40 = vmul.f32 %v4195_v37, %v381_v61  ;;  %v416_v41 = vmul.f32 %v4197_v38, %v388_v62  ;;  %v417_v44 = vmul.f32 %v4199_v42, %v395_v63  ;;  %v3590_v42 = vld [vmem:[#allocation7 + $0x280] ss:$16 sps:$4 sm:$0xff]   ;;  %v3619_v61 = vld [vmem:[#allocation7 + $0x30c] ss:$16 sps:$4 sm:$0xff]   ;;  %v3617_v63 = vld [vmem:[#allocation7 + $0x308] ss:$16 sps:$4 sm:$0xff]  }
 0x120   :  { %1622 = vmatprep.subr.bf16.mxu0 %v3580_v49  ;;  %1708 = vmatprep.subr.bf16.mxu1 %v3583_v50  ;;  %v418_v20 = vmul.f32 %v4201_v43, %v402_v9  ;;  %v451_v37 = vrot.slane %v429_v23, %v4137_v7  ;;  %v444_v43 = vrot.slane %v428_v24, %v4137_v7  ;;  %v3604_v49 = vld [vmem:[#allocation7 + $0x2c4] ss:$16 sps:$4 sm:$0xff]   ;;  %v3607_v50 = vld [vmem:[#allocation7 + $0x2cc] ss:$16 sps:$4 sm:$0xff]   ;;  %v3614_v62 = vld [vmem:[#allocation7 + $0x300] ss:$16 sps:$4 sm:$0xff]  }
 0x121   :  { %v463_v5 = vcombine.low %v415_v40, %v416_v41  ;;  %v464_v8 = vcombine.high %v415_v40, %v416_v41  ;;  %v3622_v9 = vld [vmem:[#allocation7 + $0x324] ss:$16 sps:$4 sm:$0xff]   ;;  %v3629_v40 = vld [vmem:[#allocation7 + $0x348] ss:$16 sps:$4 sm:$0xff]   ;;  %v3638_v23 = vld [vmem:[#allocation7 + $0x380] ss:$16 sps:$4 sm:$0xff]  }
 0x122   :  { %v465_v18 = vcombine.low %v417_v44, %v418_v20  ;;  %v466_v38 = vcombine.high %v417_v44, %v418_v20  ;;  %v460_v28 = vcombine.high %v437_v13, %v451_v37  ;;  %v459_v30 = vcombine.low %v437_v13, %v451_v37  ;;  %v3634_v41 = vld [vmem:[#allocation7 + $0x364] ss:$16 sps:$4 sm:$0xff]   ;;  %v3637_v44 = vld [vmem:[#allocation7 + $0x36c] ss:$16 sps:$4 sm:$0xff]   ;;  %v3647_v13 = vld [vmem:[#allocation7 + $0x3a8] ss:$16 sps:$4 sm:$0xff]  }
 0x123   :  { %1623 = vmatpush1.bf16.msra.mxu0 %v3578_v52  ;;  %1709 = vmatpush1.bf16.msra.mxu1 %v3581_v53  ;;  %v473_v14 = vrot.slane %v463_v5, %v4137_v7  ;;  %v462_v31 = vcombine.high %v444_v43, %v458_v25  ;;  %v480_v32 = vrot.slane %v464_v8, %v4137_v7  ;;  %v3640_v20 = vld [vmem:[#allocation7 + $0x384] ss:$16 sps:$4 sm:$0xff]   ;;  %v3641_v5 = vld [vmem:[#allocation7 + $0x388] ss:$16 sps:$4 sm:$0xff]   ;;  %v3649_v6 = vld [vmem:[#allocation7 + $0x3ac] ss:$16 sps:$4 sm:$0xff]  }
 0x124   :  { %1624 = vmatprep.subr.bf16.mxu0 %v3586_v58  ;;  %1710 = vmatprep.subr.bf16.mxu1 %v3589_v59  ;;  %v487_v29 = vrot.slane %v465_v18, %v4137_v7  ;;  %v494_v33 = vrot.slane %v466_v38, %v4137_v7  ;;  %v461_v34 = vcombine.low %v444_v43, %v458_v25  ;;  %v3608_v58 = vld [vmem:[#allocation7 + $0x2e0] ss:$16 sps:$4 sm:$0xff]   ;;  %v3611_v59 = vld [vmem:[#allocation7 + $0x2e8] ss:$16 sps:$4 sm:$0xff]   ;;  %v3646_v24 = vld [vmem:[#allocation7 + $0x3a4] ss:$16 sps:$4 sm:$0xff]  }
 0x125   :  { %v3644_v8 = vld [vmem:[#allocation7 + $0x3a0] ss:$16 sps:$4 sm:$0xff]   ;;  %v3652_v37 = vld [vmem:[#allocation7 + $0x3c4] ss:$16 sps:$4 sm:$0xff]   ;;  %v3655_v18 = vld [vmem:[#allocation7 + $0x3cc] ss:$16 sps:$4 sm:$0xff]  }
 0x126   :  { %v496_v35 = vcombine.high %v473_v14, %v487_v29  ;;  %v495_v36 = vcombine.low %v473_v14, %v487_v29  ;;  %v498_v47 = vcombine.high %v480_v32, %v494_v33  ;;  %v497_v48 = vcombine.low %v480_v32, %v494_v33  ;;  %v3650_v38 = vld [vmem:[#allocation7 + $0x3c0] ss:$16 sps:$4 sm:$0xff]   ;;  %v3661_v14 = vld [vmem:[#allocation7 + $0x3ec] ss:$16 sps:$4 sm:$0xff]   ;;  %v3659_v25 = vld [vmem:[#allocation7 + $0x3e8] ss:$16 sps:$4 sm:$0xff]  }
 0x127   :  { %1625 = vmatpush1.bf16.msra.mxu0 %v3584_v1  ;;  %1711 = vmatpush1.bf16.msra.mxu1 %v3587_v2  ;;  %v3631_v1 = vld [vmem:[#allocation7 + $0x34c] ss:$16 sps:$4 sm:$0xff]   ;;  %v3626_v2 = vld [vmem:[#allocation7 + $0x340] ss:$16 sps:$4 sm:$0xff]   ;;  %v629_v29 = vcombine.low %v4258_v17, %v4261_v22  ;;  %v3670_v33 = vld [vmem:[#allocation6 + $0x24] ss:$16 sps:$4 sm:$0xff]  }
 0x128   :  { %1626 = vmatprep.subr.bf16.mxu0 %v3592_v45  ;;  %1712 = vmatprep.subr.bf16.mxu1 %v3595_v19  ;;  %v4291_v51 = vpack.c.bf16 %v496_v35, %v460_v28  ;;  %v4293_v52 = vpack.c.bf16 %v495_v36, %v459_v30  ;;  %v4295_v53 = vpack.c.bf16 %v498_v47, %v462_v31  ;;  %v3632_v45 = vld [vmem:[#allocation7 + $0x360] ss:$16 sps:$4 sm:$0xff]   ;;  %v3635_v19 = vld [vmem:[#allocation7 + $0x368] ss:$16 sps:$4 sm:$0xff]   ;;  %v3667_v28 = vld [vmem:[#allocation6 + $0xc] ss:$16 sps:$4 sm:$0xff]  }
 0x129   :  { %v4297_v7 = vpack.c.bf16 %v497_v48, %v461_v34  ;;  %v3656_v43 = vld [vmem:[#allocation7 + $0x3e0] ss:$16 sps:$4 sm:$0xff]   ;;  %v3665_v31 = vld [vmem:[#allocation6 + $0x8] ss:$16 sps:$4 sm:$0xff]   ;;  %v3673_v34 = vld [vmem:[#allocation6 + $0x2c] ss:$16 sps:$4 sm:$0xff]  }
 0x12a   :  { %v3662_v30 = vld [vmem:[#allocation6] ss:$16 sps:$4 sm:$0xff]   ;;  %v3679_v36 = vld [vmem:[#allocation6 + $0x4c] ss:$16 sps:$4 sm:$0xff]   ;;  %v3677_v22 = vld [vmem:[#allocation6 + $0x48] ss:$16 sps:$4 sm:$0xff]  }
 0x12b   :  { %1627 = vmatpush1.bf16.msra.mxu0 %v3590_v42  ;;  %1713 = vmatpush1.bf16.msra.mxu1 %v3593_v21  ;;  %v3653_v42 = vld [vmem:[#allocation7 + $0x3c8] ss:$16 sps:$4 sm:$0xff]   ;;  %v3658_v21 = vld [vmem:[#allocation7 + $0x3e4] ss:$16 sps:$4 sm:$0xff]   ;;  %v3668_v35 = vld [vmem:[#allocation6 + $0x20] ss:$16 sps:$4 sm:$0xff]  }
 0x12c   :  { %1628 = vmatprep.subr.bf16.mxu0 %v3598_v26  ;;  %1714 = vmatprep.subr.bf16.mxu1 %v3601_v27  ;;  %v665_v26 = vcombine.low %v4252_v15, %v4255_v16  ;;  %v3664_v27 = vld [vmem:[#allocation6 + $0x4] ss:$16 sps:$4 sm:$0xff]   ;;  %v3671_v15 = vld [vmem:[#allocation6 + $0x28] ss:$16 sps:$4 sm:$0xff]   ;;  %v3674_v17 = vld [vmem:[#allocation6 + $0x40] ss:$16 sps:$4 sm:$0xff]  }
 0x12d   :  { %v3676_v16 = vld [vmem:[#allocation6 + $0x44] ss:$16 sps:$4 sm:$0xff]   ;;  %v3680_v47 = vld [vmem:[#allocation6 + $0x60] ss:$16 sps:$4 sm:$0xff]   ;;  %v3683_v48 = vld [vmem:[#allocation6 + $0x68] ss:$16 sps:$4 sm:$0xff]  }
 0x12e   :  { %v677_v32 = vpack.c.bf16 %v665_v26, %v629_v29  ;;  %v3751_v26 = vld [vmem:[#allocation6 + $0x1cc] ss:$16 sps:$4 sm:$0xff]   ;;  %v3754_v29 = vld [vmem:[#allocation6 + $0x1e4] ss:$16 sps:$4 sm:$0xff]  }
 0x12f   :  { %1629 = vmatpush1.bf16.msra.mxu0 %v3596_v39  ;;  %1715 = vmatpush1.bf16.msra.mxu1 %v3599_v46  ;;  %v3682_v39 = vld [vmem:[#allocation6 + $0x64] ss:$16 sps:$4 sm:$0xff]   ;;  %v3685_v46 = vld [vmem:[#allocation6 + $0x6c] ss:$16 sps:$4 sm:$0xff]  }
 0x130   :  { %1630 = vmatprep.subr.bf16.mxu0 %v3604_v49  ;;  %1716 = vmatprep.subr.bf16.mxu1 %v3607_v50  ;;  %v3688_v49 = vld [vmem:[#allocation6 + $0x84] ss:$16 sps:$4 sm:$0xff]   ;;  %v3691_v50 = vld [vmem:[#allocation6 + $0x8c] ss:$16 sps:$4 sm:$0xff]  }
 0x133   :  { %1631 = vmatpush1.bf16.msra.mxu0 %v3602_v54  ;;  %1717 = vmatpush1.bf16.msra.mxu1 %v3605_v55  ;;  %v3686_v54 = vld [vmem:[#allocation6 + $0x80] ss:$16 sps:$4 sm:$0xff]   ;;  %v3694_v55 = vld [vmem:[#allocation6 + $0xa4] ss:$16 sps:$4 sm:$0xff]  }
 0x134   :  { %1632 = vmatprep.subr.bf16.mxu0 %v3610_v56  ;;  %1718 = vmatprep.subr.bf16.mxu1 %v3613_v57  ;;  %v3697_v56 = vld [vmem:[#allocation6 + $0xac] ss:$16 sps:$4 sm:$0xff]   ;;  %v3692_v57 = vld [vmem:[#allocation6 + $0xa0] ss:$16 sps:$4 sm:$0xff]  }
 0x137   :  { %1633 = vmatpush1.bf16.msra.mxu0 %v3608_v58  ;;  %1719 = vmatpush1.bf16.msra.mxu1 %v3611_v59  ;;  %v3695_v58 = vld [vmem:[#allocation6 + $0xa8] ss:$16 sps:$4 sm:$0xff]   ;;  %v3700_v59 = vld [vmem:[#allocation6 + $0xc4] ss:$16 sps:$4 sm:$0xff]  }
 0x138   :  { %1634 = vmatprep.subr.bf16.mxu0 %v3616_v60  ;;  %1720 = vmatprep.subr.bf16.mxu1 %v3619_v61  ;;  %v3703_v60 = vld [vmem:[#allocation6 + $0xcc] ss:$16 sps:$4 sm:$0xff]   ;;  %v3698_v61 = vld [vmem:[#allocation6 + $0xc0] ss:$16 sps:$4 sm:$0xff]  }
 0x13b   :  { %1635 = vmatpush1.bf16.msra.mxu0 %v3614_v62  ;;  %1721 = vmatpush1.bf16.msra.mxu1 %v3617_v63  ;;  %v3701_v62 = vld [vmem:[#allocation6 + $0xc8] ss:$16 sps:$4 sm:$0xff]   ;;  %v3706_v63 = vld [vmem:[#allocation6 + $0xe4] ss:$16 sps:$4 sm:$0xff]  }
 0x13c   :  { %1636 = vmatprep.subr.bf16.mxu0 %v3622_v9  ;;  %1722 = vmatprep.subr.bf16.mxu1 %v3625_v10  ;;  %v3709_v9 = vld [vmem:[#allocation6 + $0xec] ss:$16 sps:$4 sm:$0xff]   ;;  %v3704_v10 = vld [vmem:[#allocation6 + $0xe0] ss:$16 sps:$4 sm:$0xff]  }
 0x13f   :  { %1637 = vmatpush1.bf16.msra.mxu0 %v3620_v11  ;;  %1723 = vmatpush1.bf16.msra.mxu1 %v3623_v12  ;;  %v3707_v11 = vld [vmem:[#allocation6 + $0xe8] ss:$16 sps:$4 sm:$0xff]   ;;  %v3712_v12 = vld [vmem:[#allocation6 + $0x104] ss:$16 sps:$4 sm:$0xff]  }
 0x140   :  { %1638 = vmatprep.subr.bf16.mxu0 %v3628_v0  ;;  %1724 = vmatprep.subr.bf16.mxu1 %v3631_v1  ;;  %v3715_v0 = vld [vmem:[#allocation6 + $0x10c] ss:$16 sps:$4 sm:$0xff]   ;;  %v3710_v1 = vld [vmem:[#allocation6 + $0x100] ss:$16 sps:$4 sm:$0xff]  }
 0x143   :  { %1639 = vmatpush1.bf16.msra.mxu0 %v3626_v2  ;;  %1725 = vmatpush1.bf16.msra.mxu1 %v3629_v40  ;;  %v3713_v2 = vld [vmem:[#allocation6 + $0x108] ss:$16 sps:$4 sm:$0xff]   ;;  %v3718_v40 = vld [vmem:[#allocation6 + $0x124] ss:$16 sps:$4 sm:$0xff]  }
 0x144   :  { %1640 = vmatprep.subr.bf16.mxu0 %v3634_v41  ;;  %1726 = vmatprep.subr.bf16.mxu1 %v3637_v44  ;;  %v3721_v41 = vld [vmem:[#allocation6 + $0x12c] ss:$16 sps:$4 sm:$0xff]   ;;  %v3716_v44 = vld [vmem:[#allocation6 + $0x120] ss:$16 sps:$4 sm:$0xff]  }
 0x147   :  { %1641 = vmatpush1.bf16.msra.mxu0 %v3632_v45  ;;  %1727 = vmatpush1.bf16.msra.mxu1 %v3635_v19  ;;  %v3719_v45 = vld [vmem:[#allocation6 + $0x128] ss:$16 sps:$4 sm:$0xff]   ;;  %v3724_v19 = vld [vmem:[#allocation6 + $0x144] ss:$16 sps:$4 sm:$0xff]  }
 0x148   :  { %1642 = vmatprep.subr.bf16.mxu0 %v3640_v20  ;;  %1728 = vmatprep.subr.bf16.mxu1 %v3643_v3  ;;  %v3727_v20 = vld [vmem:[#allocation6 + $0x14c] ss:$16 sps:$4 sm:$0xff]   ;;  %v3722_v3 = vld [vmem:[#allocation6 + $0x140] ss:$16 sps:$4 sm:$0xff]  }
 0x14b   :  { %1643 = vmatpush1.bf16.msra.mxu0 %v3638_v23  ;;  %1729 = vmatpush1.bf16.msra.mxu1 %v3641_v5  ;;  %v3725_v23 = vld [vmem:[#allocation6 + $0x148] ss:$16 sps:$4 sm:$0xff]   ;;  %v3730_v5 = vld [vmem:[#allocation6 + $0x164] ss:$16 sps:$4 sm:$0xff]  }
 0x14c   :  { %1644 = vmatprep.subr.bf16.mxu0 %v3646_v24  ;;  %1730 = vmatprep.subr.bf16.mxu1 %v3649_v6  ;;  %v3733_v24 = vld [vmem:[#allocation6 + $0x16c] ss:$16 sps:$4 sm:$0xff]   ;;  %v3728_v6 = vld [vmem:[#allocation6 + $0x160] ss:$16 sps:$4 sm:$0xff]  }
 0x14f   :  { %1645 = vmatpush1.bf16.msra.mxu0 %v3644_v8  ;;  %1731 = vmatpush1.bf16.msra.mxu1 %v3647_v13  ;;  %v3731_v8 = vld [vmem:[#allocation6 + $0x168] ss:$16 sps:$4 sm:$0xff]   ;;  %v3736_v13 = vld [vmem:[#allocation6 + $0x184] ss:$16 sps:$4 sm:$0xff]  }
 0x150   :  { %1646 = vmatprep.subr.bf16.mxu0 %v3652_v37  ;;  %1732 = vmatprep.subr.bf16.mxu1 %v3655_v18  ;;  %v3739_v37 = vld [vmem:[#allocation6 + $0x18c] ss:$16 sps:$4 sm:$0xff]   ;;  %v3734_v18 = vld [vmem:[#allocation6 + $0x180] ss:$16 sps:$4 sm:$0xff]  }
 0x153   :  { %1647 = vmatpush1.bf16.msra.mxu0 %v3650_v38  ;;  %1733 = vmatpush1.bf16.msra.mxu1 %v3653_v42  ;;  %v3737_v38 = vld [vmem:[#allocation6 + $0x188] ss:$16 sps:$4 sm:$0xff]   ;;  %v3742_v42 = vld [vmem:[#allocation6 + $0x1a4] ss:$16 sps:$4 sm:$0xff]  }
 0x154   :  { %1648 = vmatprep.subr.bf16.mxu0 %v3658_v21  ;;  %1734 = vmatprep.subr.bf16.mxu1 %v3661_v14  ;;  %v3745_v21 = vld [vmem:[#allocation6 + $0x1ac] ss:$16 sps:$4 sm:$0xff]   ;;  %v3740_v14 = vld [vmem:[#allocation6 + $0x1a0] ss:$16 sps:$4 sm:$0xff]  }
 0x157   :  { %1649 = vmatpush1.bf16.msra.mxu0 %v3656_v43  ;;  %1735 = vmatpush1.bf16.msra.mxu1 %v3659_v25  ;;  %v3743_v43 = vld [vmem:[#allocation6 + $0x1a8] ss:$16 sps:$4 sm:$0xff]   ;;  %v3748_v25 = vld [vmem:[#allocation6 + $0x1c4] ss:$16 sps:$4 sm:$0xff]  }
 0x158   :  { %2387 = vmatprep.subr.bf16.mxu0 %v3664_v27  ;;  %2473 = vmatprep.subr.bf16.mxu1 %v3667_v28  ;;  %v3746_v27 = vld [vmem:[#allocation6 + $0x1c0] ss:$16 sps:$4 sm:$0xff]   ;;  %v3749_v28 = vld [vmem:[#allocation6 + $0x1c8] ss:$16 sps:$4 sm:$0xff]  }
 0x15a   :  { %1651 = vmatmul.mubr.bf16.vlgmr.msra.gmra.mrb[0].mxu0 %v677_v32  ;;  %1737 = vmatmul.mubr.bf16.vlgmr.msra.gmra.mrb[0].mxu1 %v677_v32  ;;  %v3755_v32 = vld [vmem:[#allocation6 + $0x1e8] ss:$16 sps:$4 sm:$0xff]  }
 0x15b   :  { %2388 = vmatpush1.bf16.msra.mxu0 %v3662_v30  ;;  %2474 = vmatpush1.bf16.msra.mxu1 %v3665_v31  ;;  %v3757_v30 = vld [vmem:[#allocation6 + $0x1ec] ss:$16 sps:$4 sm:$0xff]   ;;  %v3752_v31 = vld [vmem:[#allocation6 + $0x1e0] ss:$16 sps:$4 sm:$0xff]  }
 0x15c   :  { %2389 = vmatprep.subr.bf16.mxu0 %v3670_v33  ;;  %2475 = vmatprep.subr.bf16.mxu1 %v3673_v34  ;;  %v3760_v33 = vld [vmem:[#allocation6 + $0x204] ss:$16 sps:$4 sm:$0xff]   ;;  %v3763_v34 = vld [vmem:[#allocation6 + $0x20c] ss:$16 sps:$4 sm:$0xff]  }
 0x15d   :  { %2419 = vmatprep.mubr.bf16.mxu0 %v4291_v51  ;;  %2505 = vmatprep.mubr.bf16.mxu1 %v4291_v51  ;;  %v3689_v51 = vld [vmem:[#allocation6 + $0x88] ss:$16 sps:$4 sm:$0xff]  }
 0x15f   :  { %2390 = vmatpush1.bf16.msra.mxu0 %v3668_v35  ;;  %2476 = vmatpush1.bf16.msra.mxu1 %v3671_v15  ;;  %v3758_v35 = vld [vmem:[#allocation6 + $0x200] ss:$16 sps:$4 sm:$0xff]   ;;  %v3761_v15 = vld [vmem:[#allocation6 + $0x208] ss:$16 sps:$4 sm:$0xff]  }
 0x160   :  { %2391 = vmatprep.subr.bf16.mxu0 %v3676_v16  ;;  %2477 = vmatprep.subr.bf16.mxu1 %v3679_v36  ;;  %v3766_v16 = vld [vmem:[#allocation6 + $0x224] ss:$16 sps:$4 sm:$0xff]   ;;  %v3769_v36 = vld [vmem:[#allocation6 + $0x22c] ss:$16 sps:$4 sm:$0xff]  }
 0x163   :  { %2392 = vmatpush1.bf16.msra.mxu0 %v3674_v17  ;;  %2478 = vmatpush1.bf16.msra.mxu1 %v3677_v22  ;;  %v3764_v17 = vld [vmem:[#allocation6 + $0x220] ss:$16 sps:$4 sm:$0xff]   ;;  %v3767_v22 = vld [vmem:[#allocation6 + $0x228] ss:$16 sps:$4 sm:$0xff]  }
 0x164   :  { %2393 = vmatprep.subr.bf16.mxu0 %v3682_v39  ;;  %2479 = vmatprep.subr.bf16.mxu1 %v3685_v46  ;;  %v3772_v39 = vld [vmem:[#allocation6 + $0x244] ss:$16 sps:$4 sm:$0xff]   ;;  %v3775_v46 = vld [vmem:[#allocation6 + $0x24c] ss:$16 sps:$4 sm:$0xff]  }
 0x167   :  { %2394 = vmatpush1.bf16.msra.mxu0 %v3680_v47  ;;  %2480 = vmatpush1.bf16.msra.mxu1 %v3683_v48  ;;  %v3770_v47 = vld [vmem:[#allocation6 + $0x240] ss:$16 sps:$4 sm:$0xff]   ;;  %v3773_v48 = vld [vmem:[#allocation6 + $0x248] ss:$16 sps:$4 sm:$0xff]  }
 0x168   :  { %2395 = vmatprep.subr.bf16.mxu0 %v3688_v49  ;;  %2481 = vmatprep.subr.bf16.mxu1 %v3691_v50  ;;  %v3778_v49 = vld [vmem:[#allocation6 + $0x264] ss:$16 sps:$4 sm:$0xff]   ;;  %v3776_v50 = vld [vmem:[#allocation6 + $0x260] ss:$16 sps:$4 sm:$0xff]  }
 0x16b   :  { %2396 = vmatpush1.bf16.msra.mxu0 %v3686_v54  ;;  %2482 = vmatpush1.bf16.msra.mxu1 %v3689_v51  ;;  %v3779_v54 = vld [vmem:[#allocation6 + $0x268] ss:$16 sps:$4 sm:$0xff]   ;;  %v3784_v51 = vld [vmem:[#allocation6 + $0x284] ss:$16 sps:$4 sm:$0xff]  }
 0x16c   :  { %2397 = vmatprep.subr.bf16.mxu0 %v3694_v55  ;;  %2483 = vmatprep.subr.bf16.mxu1 %v3697_v56  ;;  %v3782_v55 = vld [vmem:[#allocation6 + $0x280] ss:$16 sps:$4 sm:$0xff]   ;;  %v3785_v56 = vld [vmem:[#allocation6 + $0x288] ss:$16 sps:$4 sm:$0xff]  }
 0x16f   :  { %2398 = vmatpush1.bf16.msra.mxu0 %v3692_v57  ;;  %2484 = vmatpush1.bf16.msra.mxu1 %v3695_v58  ;;  %v3790_v57 = vld [vmem:[#allocation6 + $0x2a4] ss:$16 sps:$4 sm:$0xff]   ;;  %v3793_v58 = vld [vmem:[#allocation6 + $0x2ac] ss:$16 sps:$4 sm:$0xff]  }
 0x170   :  { %2399 = vmatprep.subr.bf16.mxu0 %v3700_v59  ;;  %2485 = vmatprep.subr.bf16.mxu1 %v3703_v60  ;;  %v3788_v59 = vld [vmem:[#allocation6 + $0x2a0] ss:$16 sps:$4 sm:$0xff]   ;;  %v3791_v60 = vld [vmem:[#allocation6 + $0x2a8] ss:$16 sps:$4 sm:$0xff]  }
 0x173   :  { %2400 = vmatpush1.bf16.msra.mxu0 %v3698_v61  ;;  %2486 = vmatpush1.bf16.msra.mxu1 %v3701_v62  ;;  %v3796_v61 = vld [vmem:[#allocation6 + $0x2c4] ss:$16 sps:$4 sm:$0xff]   ;;  %v3799_v62 = vld [vmem:[#allocation6 + $0x2cc] ss:$16 sps:$4 sm:$0xff]  }
 0x174   :  { %2401 = vmatprep.subr.bf16.mxu0 %v3706_v63  ;;  %2487 = vmatprep.subr.bf16.mxu1 %v3709_v9  ;;  %v3794_v63 = vld [vmem:[#allocation6 + $0x2c0] ss:$16 sps:$4 sm:$0xff]   ;;  %v3797_v9 = vld [vmem:[#allocation6 + $0x2c8] ss:$16 sps:$4 sm:$0xff]  }
 0x177   :  { %2402 = vmatpush1.bf16.msra.mxu0 %v3704_v10  ;;  %2488 = vmatpush1.bf16.msra.mxu1 %v3707_v11  ;;  %v3802_v10 = vld [vmem:[#allocation6 + $0x2e4] ss:$16 sps:$4 sm:$0xff]   ;;  %v3805_v11 = vld [vmem:[#allocation6 + $0x2ec] ss:$16 sps:$4 sm:$0xff]  }
 0x178   :  { %2403 = vmatprep.subr.bf16.mxu0 %v3712_v12  ;;  %2489 = vmatprep.subr.bf16.mxu1 %v3715_v0  ;;  %v3800_v12 = vld [vmem:[#allocation6 + $0x2e0] ss:$16 sps:$4 sm:$0xff]   ;;  %v3803_v0 = vld [vmem:[#allocation6 + $0x2e8] ss:$16 sps:$4 sm:$0xff]  }
 0x17b   :  { %2404 = vmatpush1.bf16.msra.mxu0 %v3710_v1  ;;  %2490 = vmatpush1.bf16.msra.mxu1 %v3713_v2  ;;  %v3808_v1 = vld [vmem:[#allocation6 + $0x304] ss:$16 sps:$4 sm:$0xff]   ;;  %v3811_v2 = vld [vmem:[#allocation6 + $0x30c] ss:$16 sps:$4 sm:$0xff]  }
 0x17c   :  { %2405 = vmatprep.subr.bf16.mxu0 %v3718_v40  ;;  %2491 = vmatprep.subr.bf16.mxu1 %v3721_v41  ;;  %v3806_v40 = vld [vmem:[#allocation6 + $0x300] ss:$16 sps:$4 sm:$0xff]   ;;  %v3809_v41 = vld [vmem:[#allocation6 + $0x308] ss:$16 sps:$4 sm:$0xff]  }
 0x17f   :  { %2406 = vmatpush1.bf16.msra.mxu0 %v3716_v44  ;;  %2492 = vmatpush1.bf16.msra.mxu1 %v3719_v45  ;;  %v3814_v44 = vld [vmem:[#allocation6 + $0x324] ss:$16 sps:$4 sm:$0xff]   ;;  %v3817_v45 = vld [vmem:[#allocation6 + $0x32c] ss:$16 sps:$4 sm:$0xff]  }
 0x180   :  { %2407 = vmatprep.subr.bf16.mxu0 %v3724_v19  ;;  %2493 = vmatprep.subr.bf16.mxu1 %v3727_v20  ;;  %v3812_v19 = vld [vmem:[#allocation6 + $0x320] ss:$16 sps:$4 sm:$0xff]   ;;  %v3815_v20 = vld [vmem:[#allocation6 + $0x328] ss:$16 sps:$4 sm:$0xff]  }
 0x183   :  { %2408 = vmatpush1.bf16.msra.mxu0 %v3722_v3  ;;  %2494 = vmatpush1.bf16.msra.mxu1 %v3725_v23  ;;  %v3820_v3 = vld [vmem:[#allocation6 + $0x344] ss:$16 sps:$4 sm:$0xff]   ;;  %v3823_v23 = vld [vmem:[#allocation6 + $0x34c] ss:$16 sps:$4 sm:$0xff]  }
 0x184   :  { %2409 = vmatprep.subr.bf16.mxu0 %v3730_v5  ;;  %2495 = vmatprep.subr.bf16.mxu1 %v3733_v24  ;;  %v3818_v5 = vld [vmem:[#allocation6 + $0x340] ss:$16 sps:$4 sm:$0xff]   ;;  %v3821_v24 = vld [vmem:[#allocation6 + $0x348] ss:$16 sps:$4 sm:$0xff]  }
 0x187   :  { %2410 = vmatpush1.bf16.msra.mxu0 %v3728_v6  ;;  %2496 = vmatpush1.bf16.msra.mxu1 %v3731_v8  ;;  %v3826_v6 = vld [vmem:[#allocation6 + $0x364] ss:$16 sps:$4 sm:$0xff]   ;;  %v3829_v8 = vld [vmem:[#allocation6 + $0x36c] ss:$16 sps:$4 sm:$0xff]  }
 0x188   :  { %2411 = vmatprep.subr.bf16.mxu0 %v3736_v13  ;;  %2497 = vmatprep.subr.bf16.mxu1 %v3739_v37  ;;  %v3824_v13 = vld [vmem:[#allocation6 + $0x360] ss:$16 sps:$4 sm:$0xff]   ;;  %v3827_v37 = vld [vmem:[#allocation6 + $0x368] ss:$16 sps:$4 sm:$0xff]  }
 0x18b   :  { %2412 = vmatpush1.bf16.msra.mxu0 %v3734_v18  ;;  %2498 = vmatpush1.bf16.msra.mxu1 %v3737_v38  ;;  %v3832_v18 = vld [vmem:[#allocation6 + $0x384] ss:$16 sps:$4 sm:$0xff]   ;;  %v3835_v38 = vld [vmem:[#allocation6 + $0x38c] ss:$16 sps:$4 sm:$0xff]  }
 0x18c   :  { %2413 = vmatprep.subr.bf16.mxu0 %v3742_v42  ;;  %2499 = vmatprep.subr.bf16.mxu1 %v3745_v21  ;;  %v3830_v42 = vld [vmem:[#allocation6 + $0x380] ss:$16 sps:$4 sm:$0xff]   ;;  %v3833_v21 = vld [vmem:[#allocation6 + $0x388] ss:$16 sps:$4 sm:$0xff]  }
 0x18f   :  { %2414 = vmatpush1.bf16.msra.mxu0 %v3740_v14  ;;  %2500 = vmatpush1.bf16.msra.mxu1 %v3743_v43  ;;  %v3838_v14 = vld [vmem:[#allocation6 + $0x3a4] ss:$16 sps:$4 sm:$0xff]   ;;  %v3841_v43 = vld [vmem:[#allocation6 + $0x3ac] ss:$16 sps:$4 sm:$0xff]  }
 0x190   :  { %2415 = vmatprep.subr.bf16.mxu0 %v3748_v25  ;;  %2501 = vmatprep.subr.bf16.mxu1 %v3751_v26  ;;  %v3836_v25 = vld [vmem:[#allocation6 + $0x3a0] ss:$16 sps:$4 sm:$0xff]   ;;  %v3839_v26 = vld [vmem:[#allocation6 + $0x3a8] ss:$16 sps:$4 sm:$0xff]  }
 0x193   :  { %2416 = vmatpush1.bf16.msra.mxu0 %v3746_v27  ;;  %2502 = vmatpush1.bf16.msra.mxu1 %v3749_v28  ;;  %v3844_v27 = vld [vmem:[#allocation6 + $0x3c4] ss:$16 sps:$4 sm:$0xff]   ;;  %v3847_v28 = vld [vmem:[#allocation6 + $0x3cc] ss:$16 sps:$4 sm:$0xff]  }
 0x194   :  { %2417 = vmatprep.subr.bf16.mxu0 %v3754_v29  ;;  %2503 = vmatprep.subr.bf16.mxu1 %v3757_v30  ;;  %v3842_v29 = vld [vmem:[#allocation6 + $0x3c0] ss:$16 sps:$4 sm:$0xff]   ;;  %v3845_v30 = vld [vmem:[#allocation6 + $0x3c8] ss:$16 sps:$4 sm:$0xff]  }
 0x197   :  { %2418 = vmatpush1.bf16.msra.mxu0 %v3752_v31  ;;  %2504 = vmatpush1.bf16.msra.mxu1 %v3755_v32  ;;  %v3850_v31 = vld [vmem:[#allocation6 + $0x3e4] ss:$16 sps:$4 sm:$0xff]   ;;  %v3853_v32 = vld [vmem:[#allocation6 + $0x3ec] ss:$16 sps:$4 sm:$0xff]  }
 0x198   :  { %2430 = vmatprep.subr.bf16.mxu0 %v3760_v33  ;;  %2516 = vmatprep.subr.bf16.mxu1 %v3763_v34  ;;  %v3848_v33 = vld [vmem:[#allocation6 + $0x3e0] ss:$16 sps:$4 sm:$0xff]   ;;  %v3851_v34 = vld [vmem:[#allocation6 + $0x3e8] ss:$16 sps:$4 sm:$0xff]  }
 0x19a   :  { %2420 = vmatmul.mubr.bf16.vlgmr.msra.gmra.mrb[0].mxu0 %v4293_v52  ;;  %2506 = vmatmul.mubr.bf16.vlgmr.msra.gmra.mrb[0].mxu1 %v4293_v52  ;;  %v3781_v52 = vld [vmem:[#allocation6 + $0x26c] ss:$16 sps:$4 sm:$0xff]  }
 0x19b   :  { %2431 = vmatpush1.bf16.msra.mxu0 %v3758_v35  ;;  %2462 = vmatprep.mubr.bf16.mxu0 %v4295_v53  ;;  %v3854_v35 = vld [vmem:[#allocation9 + $0x40] sm:$0xff]  }
 0x19c   :  { %2517 = vmatpush1.bf16.msra.mxu1 %v3761_v15  ;;  %2548 = vmatprep.mubr.bf16.mxu1 %v4295_v53  ;;  %v3787_v53 = vld [vmem:[#allocation6 + $0x28c] ss:$16 sps:$4 sm:$0xff]   ;;  %v3855_v15 = vld [vmem:[#allocation9 + $0xc0] sm:$0xff]  }
 0x19d   :  { %2432 = vmatprep.subr.bf16.mxu0 %v3766_v16  ;;  %2518 = vmatprep.subr.bf16.mxu1 %v3769_v36  ;;  %v3856_v16 = vld [vmem:[#allocation9] sm:$0xff]  }
 0x19e   :  { %v3857_v36 = vld [vmem:[#allocation9 + $0x80] sm:$0xff]  }
 0x19f   :  { %2433 = vmatpush1.bf16.msra.mxu0 %v3764_v17  ;;  %v3858_v17 = vld [vmem:[#allocation9 + $0x48] sm:$0xff]  }
 0x1a0   :  { %2519 = vmatpush1.bf16.msra.mxu1 %v3767_v22  ;;  %2434 = vmatprep.subr.bf16.mxu0 %v3772_v39  ;;  %v3859_v22 = vld [vmem:[#allocation9 + $0xc8] sm:$0xff]  }
 0x1a1   :  { %2520 = vmatprep.subr.bf16.mxu1 %v3775_v46  ;;  %v3860_v39 = vld [vmem:[#allocation9 + $0x8] sm:$0xff]  }
 0x1a2   :  { %v3861_v46 = vld [vmem:[#allocation9 + $0x88] sm:$0xff]  }
 0x1a3   :  { %2435 = vmatpush1.bf16.msra.mxu0 %v3770_v47  ;;  %v3862_v47 = vld [vmem:[#allocation9 + $0x50] sm:$0xff]  }
 0x1a4   :  { %2521 = vmatpush1.bf16.msra.mxu1 %v3773_v48  ;;  %2436 = vmatprep.subr.bf16.mxu0 %v3778_v49  ;;  %v3863_v48 = vld [vmem:[#allocation9 + $0xd0] sm:$0xff]  }
 0x1a5   :  { %2522 = vmatprep.subr.bf16.mxu1 %v3781_v52  ;;  %v3864_v49 = vld [vmem:[#allocation9 + $0x10] sm:$0xff]  }
 0x1a6   :  { %v3865_v52 = vld [vmem:[#allocation9 + $0x90] sm:$0xff]  }
 0x1a7   :  { %2437 = vmatpush1.bf16.msra.mxu0 %v3776_v50  ;;  %v3866_v50 = vld [vmem:[#allocation9 + $0x58] sm:$0xff]  }
 0x1a8   :  { %2523 = vmatpush1.bf16.msra.mxu1 %v3779_v54  ;;  %2438 = vmatprep.subr.bf16.mxu0 %v3784_v51  ;;  %v3867_v54 = vld [vmem:[#allocation9 + $0xd8] sm:$0xff]  }
 0x1a9   :  { %2524 = vmatprep.subr.bf16.mxu1 %v3787_v53  ;;  %v3868_v51 = vld [vmem:[#allocation9 + $0x18] sm:$0xff]   ;;  %v3870_v53 = vld [vmem:[#allocation9 + $0x60] sm:$0xff]  }
 0x1ab   :  { %2439 = vmatpush1.bf16.msra.mxu0 %v3782_v55  ;;  %v3871_v55 = vld [vmem:[#allocation9 + $0xe0] sm:$0xff]  }
 0x1ac   :  { %2525 = vmatpush1.bf16.msra.mxu1 %v3785_v56  ;;  %2440 = vmatprep.subr.bf16.mxu0 %v3790_v57  ;;  %v3872_v56 = vld [vmem:[#allocation9 + $0x20] sm:$0xff]  }
 0x1ad   :  { %2526 = vmatprep.subr.bf16.mxu1 %v3793_v58  ;;  %v3873_v57 = vld [vmem:[#allocation9 + $0xa0] sm:$0xff]   ;;  %v3874_v58 = vld [vmem:[#allocation9 + $0x68] sm:$0xff]  }
 0x1af   :  { %2441 = vmatpush1.bf16.msra.mxu0 %v3788_v59  ;;  %v3875_v59 = vld [vmem:[#allocation9 + $0xe8] sm:$0xff]  }
 0x1b0   :  { %2527 = vmatpush1.bf16.msra.mxu1 %v3791_v60  ;;  %2442 = vmatprep.subr.bf16.mxu0 %v3796_v61  ;;  %v3876_v60 = vld [vmem:[#allocation9 + $0x28] sm:$0xff]  }
 0x1b1   :  { %2528 = vmatprep.subr.bf16.mxu1 %v3799_v62  ;;  %v3877_v61 = vld [vmem:[#allocation9 + $0xa8] sm:$0xff]   ;;  %v3878_v62 = vld [vmem:[#allocation9 + $0x70] sm:$0xff]  }
 0x1b3   :  { %2443 = vmatpush1.bf16.msra.mxu0 %v3794_v63  ;;  %v3879_v63 = vld [vmem:[#allocation9 + $0xf0] sm:$0xff]  }
 0x1b4   :  { %2529 = vmatpush1.bf16.msra.mxu1 %v3797_v9  ;;  %2444 = vmatprep.subr.bf16.mxu0 %v3802_v10  ;;  %v3880_v9 = vld [vmem:[#allocation9 + $0x30] sm:$0xff]  }
 0x1b5   :  { %2530 = vmatprep.subr.bf16.mxu1 %v3805_v11  ;;  %v3881_v10 = vld [vmem:[#allocation9 + $0xb0] sm:$0xff]   ;;  %v3882_v11 = vld [vmem:[#allocation9 + $0x78] sm:$0xff]  }
 0x1b7   :  { %2445 = vmatpush1.bf16.msra.mxu0 %v3800_v12  ;;  %v3883_v12 = vld [vmem:[#allocation9 + $0xf8] sm:$0xff]  }
 0x1b8   :  { %2531 = vmatpush1.bf16.msra.mxu1 %v3803_v0  ;;  %2446 = vmatprep.subr.bf16.mxu0 %v3808_v1  ;;  %v3884_v0 = vld [vmem:[#allocation9 + $0x38] sm:$0xff]  }
 0x1b9   :  { %2532 = vmatprep.subr.bf16.mxu1 %v3811_v2  ;;  %v3885_v1 = vld [vmem:[#allocation9 + $0xb8] sm:$0xff]   ;;  %v2563_v2 = vsub.s32 0, %v4134_v4 }
 0x1bb   :  { %2447 = vmatpush1.bf16.msra.mxu0 %v3806_v40  ;;  %v2559_v40 = vld [vmem:[%s4329_s4] sm:$0xf] }
 0x1bc   :  { %2533 = vmatpush1.bf16.msra.mxu1 %v3809_v41  ;;  %2448 = vmatprep.subr.bf16.mxu0 %v3814_v44  ;;  %v2571_v41 = vsub.s32 2, %v4134_v4  ;;  %v2567_v44 = vsub.s32 1, %v4134_v4 }
 0x1bd   :  { %2534 = vmatprep.subr.bf16.mxu1 %v3817_v45  ;;  %v2575_v45 = vsub.s32 3, %v4134_v4 }
 0x1bf   :  { %2449 = vmatpush1.bf16.msra.mxu0 %v3812_v19  ;;  %v2564_v19 = vrot.slane %v2559_v40, %v2563_v2 }
 0x1c0   :  { %2535 = vmatpush1.bf16.msra.mxu1 %v3815_v20  ;;  %2450 = vmatprep.subr.bf16.mxu0 %v3820_v3  ;;  %v2572_v20 = vrot.slane %v2559_v40, %v2571_v41  ;;  %v2568_v3 = vrot.slane %v2559_v40, %v2567_v44 }
 0x1c1   :  { %2536 = vmatprep.subr.bf16.mxu1 %v3823_v23  ;;  %v2576_v23 = vrot.slane %v2559_v40, %v2575_v45 }
 0x1c3   :  { %2451 = vmatpush1.bf16.msra.mxu0 %v3818_v5 }
 0x1c4   :  { %2537 = vmatpush1.bf16.msra.mxu1 %v3821_v24  ;;  %2452 = vmatprep.subr.bf16.mxu0 %v3826_v6 }
 0x1c5   :  { %2538 = vmatprep.subr.bf16.mxu1 %v3829_v8 }
 0x1c7   :  { %2453 = vmatpush1.bf16.msra.mxu0 %v3824_v13 }
 0x1c8   :  { %2539 = vmatpush1.bf16.msra.mxu1 %v3827_v37  ;;  %2454 = vmatprep.subr.bf16.mxu0 %v3832_v18 }
 0x1c9   :  { %2540 = vmatprep.subr.bf16.mxu1 %v3835_v38 }
 0x1cb   :  { %2455 = vmatpush1.bf16.msra.mxu0 %v3830_v42 }
 0x1cc   :  { %2541 = vmatpush1.bf16.msra.mxu1 %v3833_v21  ;;  %2456 = vmatprep.subr.bf16.mxu0 %v3838_v14 }
 0x1cd   :  { %2542 = vmatprep.subr.bf16.mxu1 %v3841_v43 }
 0x1cf   :  { %2457 = vmatpush1.bf16.msra.mxu0 %v3836_v25 }
 0x1d0   :  { %2543 = vmatpush1.bf16.msra.mxu1 %v3839_v26  ;;  %2458 = vmatprep.subr.bf16.mxu0 %v3844_v27 }
 0x1d1   :  { %2544 = vmatprep.subr.bf16.mxu1 %v3847_v28 }
 0x1d3   :  { %2459 = vmatpush1.bf16.msra.mxu0 %v3842_v29 }
 0x1d4   :  { %2545 = vmatpush1.bf16.msra.mxu1 %v3845_v30  ;;  %2460 = vmatprep.subr.bf16.mxu0 %v3850_v31 }
 0x1d5   :  { %2546 = vmatprep.subr.bf16.mxu1 %v3853_v32 }
 0x1d7   :  { %2461 = vmatpush1.bf16.msra.mxu0 %v3848_v33 }
 0x1d8   :  { %2547 = vmatpush1.bf16.msra.mxu1 %v3851_v34  ;;  %3387 = vmatprep.subr.bf16.mxu0 %v3854_v35 }
 0x1d9   :  { %3409 = vmatprep.subr.bf16.mxu1 %v3855_v15 }
 0x1da   :  { %2463 = vmatmul.mubr.bf16.vlgmr.msra.gmra.mrb[0].mxu0 %v4297_v7 }
 0x1db   :  { %2549 = vmatmul.mubr.bf16.vlgmr.msra.gmra.mrb[0].mxu1 %v4297_v7  ;;  %3388 = vmatpush3.bf16.msra.mxu0 %v3856_v16  ;;  %v3869_v7 = vld [vmem:[#allocation9 + $0x98] sm:$0xff]  }
 0x1dc   :  { %3410 = vmatpush3.bf16.msra.mxu1 %v3857_v36  ;;  %3389 = vmatprep.subr.bf16.mxu0 %v3858_v17 }
 0x1dd   :  { %3411 = vmatprep.subr.bf16.mxu1 %v3859_v22 }
 0x1df   :  { %3390 = vmatpush3.bf16.msra.mxu0 %v3860_v39 }
 0x1e0   :  { %3412 = vmatpush3.bf16.msra.mxu1 %v3861_v46  ;;  %3391 = vmatprep.subr.bf16.mxu0 %v3862_v47  ;;  %v4024_v46 = vmov 1966171168  }
 0x1e1   :  { %3413 = vmatprep.subr.bf16.mxu1 %v3863_v48  ;;  %v2950_v47 = vunpack.c.l.s4 %v4024_v46 }
 0x1e3   :  { %3392 = vmatpush3.bf16.msra.mxu0 %v3864_v49  ;;  %v3311_v49 = vld [vmem:[%s4331_s6] ss:$0 sm:$0xff] }
 0x1e4   :  { %3414 = vmatpush3.bf16.msra.mxu1 %v3865_v52  ;;  %3393 = vmatprep.subr.bf16.mxu0 %v3866_v50 }
 0x1e5   :  { %3415 = vmatprep.subr.bf16.mxu1 %v3867_v54 }
 0x1e7   :  { %3394 = vmatpush3.bf16.msra.mxu0 %v3868_v51 }
 0x1e8   :  { %3416 = vmatpush3.bf16.msra.mxu1 %v3869_v7  ;;  %3395 = vmatprep.subr.bf16.mxu0 %v3870_v53 }
 0x1e9   :  { %3417 = vmatprep.subr.bf16.mxu1 %v3871_v55 }
 0x1eb   :  { %3396 = vmatpush3.bf16.msra.mxu0 %v3872_v56 }
 0x1ec   :  { %3418 = vmatpush3.bf16.msra.mxu1 %v3873_v57  ;;  %3397 = vmatprep.subr.bf16.mxu0 %v3874_v58 }
 0x1ed   :  { %3419 = vmatprep.subr.bf16.mxu1 %v3875_v59  ;;  %v2951_v59 = vunpack.c.0.s8 %v2950_v47 }
 0x1ef   :  { %3398 = vmatpush3.bf16.msra.mxu0 %v3876_v60 }
 0x1f0   :  { %3420 = vmatpush3.bf16.msra.mxu1 %v3877_v61  ;;  %3399 = vmatprep.subr.bf16.mxu0 %v3878_v62 }
 0x1f1   :  { %3421 = vmatprep.subr.bf16.mxu1 %v3879_v63 }
 0x1f3   :  { %3400 = vmatpush3.bf16.msra.mxu0 %v3880_v9  ;;  %v2954_v9 = vsub.s32 %v2951_v59, %v4134_v4 }
 0x1f4   :  { %3422 = vmatpush3.bf16.msra.mxu1 %v3881_v10  ;;  %3401 = vmatprep.subr.bf16.mxu0 %v3882_v11 }
 0x1f5   :  { %3423 = vmatprep.subr.bf16.mxu1 %v3883_v12 }
 0x1f7   :  { %3402 = vmatpush3.bf16.msra.mxu0 %v3884_v0 }
 0x1f8   :  { %3424 = vmatpush3.bf16.msra.mxu1 %v3885_v1 }
 0x2ad   :  { %v2464_v5 = vpop.f32.mrb[0].mxu0 }
 0x2ae   :  { %v2581_v24 = vadd.f32 %v2564_v19, %v2464_v5  ;;  %v2550_v6 = vpop.f32.mrb[0].mxu1  ;;  %v2466_v8 = vpop.f32.mrb[1].mxu0 }
 0x2af   :  { %v2583_v13 = vadd.f32 %v2572_v20, %v2550_v6  ;;  %v2582_v37 = vadd.f32 %v2568_v3, %v2466_v8  ;;  %v2552_v18 = vpop.f32.mrb[1].mxu1  ;;  %v2468_v38 = vpop.f32.mrb[2].mxu0 }
 0x2b0   :  { %v2584_v42 = vadd.f32 %v2576_v23, %v2552_v18  ;;  %v2585_v21 = vadd.f32 %v2564_v19, %v2468_v38  ;;  %v2554_v14 = vpop.f32.mrb[2].mxu1  ;;  %v2470_v43 = vpop.f32.mrb[3].mxu0  ;;  %v2589_v28 = vmax.f32 %v2581_v24, 0.0 }
 0x2b1   :  { %v2587_v25 = vadd.f32 %v2572_v20, %v2554_v14  ;;  %v2586_v26 = vadd.f32 %v2568_v3, %v2470_v43  ;;  %v2556_v27 = vpop.f32.mrb[3].mxu1  ;;  %v2591_v31 = vmax.f32 %v2583_v13, 0.0  ;;  %v2590_v32 = vmax.f32 %v2582_v37, 0.0 }
 0x2b2   :  { %v2593_v29 = vmax.f32 %v2585_v21, 0.0  ;;  %v2588_v30 = vadd.f32 %v2576_v23, %v2556_v27  ;;  %v2592_v35 = vmax.f32 %v2584_v42, 0.0 }
 0x2b3   :  { %v2595_v33 = vmax.f32 %v2587_v25, 0.0  ;;  %v2594_v34 = vmax.f32 %v2586_v26, 0.0 }
 0x2b4   :  { %v2597_v15 = vpack.c.bf16 %v2593_v29, %v2589_v28  ;;  %v2596_v16 = vmax.f32 %v2588_v30, 0.0 }
 0x2b5   :  { %v2599_v36 = vpack.c.bf16 %v2595_v33, %v2591_v31  ;;  %v2598_v17 = vpack.c.bf16 %v2594_v34, %v2590_v32 }
 0x2b6   :  { %v2600_v22 = vpack.c.bf16 %v2596_v16, %v2592_v35 }
 0x2b7   :  { %2896 = vmatprep.mubr.bf16.mxu0 %v2598_v17 }
 0x2b8   :  { %2937 = vmatprep.mubr.bf16.mxu1 %v2600_v22  ;;  %2897 = vmatmul.mubr.bf16.vlgmr.msra.gmra.mrb[4].mxu0 %v2597_v15 }
 0x2b9   :  { %2938 = vmatmul.mubr.bf16.vlgmr.msra.gmra.mrb[4].mxu1 %v2599_v36 }
 0x38b   :  { %v3403_v39 = vpop.f32.mrb[4].mxu0 }
 0x38c   :  { %v3425_v48 = vpop.f32.mrb[4].mxu1  ;;  %v3404_v52 = vpop.f32.mrb[5].mxu0 }
 0x38d   :  { %v3405_v50 = vadd.f32 %v3404_v52, %v3403_v39  ;;  %v3426_v54 = vpop.f32.mrb[5].mxu1  ;;  %v3406_v51 = vpop.f32.mrb[6].mxu0 }
 0x38e   :  { %v3427_v7 = vadd.f32 %v3426_v54, %v3425_v48  ;;  %v3428_v53 = vpop.f32.mrb[6].mxu1  ;;  %v3407_v55 = vpop.f32.mrb[7].mxu0 }
 0x38f   :  { %v2899_v56 = vadd.f32 %v3405_v50, %v3311_v49  ;;  %v3408_v57 = vadd.f32 %v3407_v55, %v3406_v51  ;;  %v3429_v58 = vpop.f32.mrb[7].mxu1 }
 0x390   :  { %v3430_v60 = vadd.f32 %v3429_v58, %v3428_v53 }
 0x391   :  { %v2940_v61 = vadd.f32 %v3427_v7, %v2899_v56  ;;  %v2902_v62 = vadd.f32 %v3408_v57, %v3311_v49 }
 0x393   :  { %v2943_v63 = vadd.f32 %v3430_v60, %v2902_v62 }
 0x395   :  { %v2946_v10 = vpack.c.bf16 %v2943_v63, %v2940_v61 }
 0x397   :  { %v2955_v11 = vrot.slane %v2946_v10, %v2954_v9 }
 0x399   :  { %3345 = vst.sshfl [vmem:[#allocation10] sm:$0x1 pattern:$0x73625140] %v2955_v11 }
 0x3a0   :  { %v3030_v12 = vld [vmem:[#allocation10] sm:$0x1] }
 0x3a1   :  { %3031 = vst [vmem:[%s4332_s7] sm:$0x1] %v3030_v12 }
 0x3a2   :  { %3048 = vsyncpa [#allocation3], 1 }
 0x3a3   :  { %3049 = vsyncpa [#allocation5], 1 }
 0x3a4   :  { %3050 = vsyncpa [#allocation8], 1 }

</bundles_post_ra>
